<compile_context>
chip_gen: v5e
topology: v5e:2x2
jax: 0.10.0
libtpu: 0.0.40
codegen_flags: <defaults>
</compile_context>

<pallas_src>
import functools
import math

import jax
import jax.numpy as jnp
from jax.experimental import pallas as pl
from jax.experimental.pallas import tpu as pltpu

_LANE = 128


def _round_up(v, m):
    return (v + m - 1) // m * m


def _inverted_residual_kernel(x_ref, w_exp_ref, b1_ref, w_dw_ref,
                              w_proj_ref, b2_ref, o_ref, hp_ref,
                              *, k, s, pad, shortcut):
    """block_n images per grid step; all channel dims lane-padded to 128."""
    nb, H, W, Cin_p = x_ref.shape
    Cm_p = w_exp_ref.shape[1]
    Cout_p = w_proj_ref.shape[1]
    _, Hp, Wp_pad, _ = hp_ref.shape
    Ho, Wo = o_ref.shape[1], o_ref.shape[2]

    x = x_ref[...]                                       # (nb, H, W, Cin_p) f32

    # ---- 1x1 expansion conv (BN scale pre-folded into weights) + bias + ReLU6 ----
    xm = x.reshape(nb * H * W, Cin_p)
    h = jnp.dot(xm.astype(w_exp_ref.dtype), w_exp_ref[...],
                preferred_element_type=jnp.float32)      # (nb*H*W, Cm_p)
    h = jnp.clip(h + b1_ref[...], 0.0, 6.0).reshape(nb, H, W, Cm_p)

    # ---- depthwise k x k conv (stride s, zero padding) + ReLU6 ----
    # Zero only the halo strips (never written by the interior store); the
    # interior is fully overwritten each step.  Correct under any megacore
    # sharding of the parallel batch axis.
    top = pad
    bot = Hp - pad - H
    left = pad
    right = Wp_pad - left - W
    if top > 0:
        hp_ref[:, :top, :, :] = jnp.zeros((nb, top, Wp_pad, Cm_p), jnp.float32)
    if bot > 0:
        hp_ref[:, Hp - bot:, :, :] = jnp.zeros((nb, bot, Wp_pad, Cm_p), jnp.float32)
    if left > 0:
        hp_ref[:, top:top + H, :left, :] = jnp.zeros((nb, H, left, Cm_p), jnp.float32)
    if right > 0:
        hp_ref[:, top:top + H, left + W:, :] = jnp.zeros((nb, H, right, Cm_p),
                                                         jnp.float32)
    hp_ref[:, top:top + H, left:left + W, :] = h

    wdw = w_dw_ref[...]                                  # (k, k, Cm_p)
    acc = jnp.zeros((nb, Ho, Wo, Cm_p), jnp.float32)
    for di in range(k):                                  # static k*k tap unroll
        for dj in range(k):
            if s == 1:
                patch = hp_ref[:, di:di + Ho, dj:dj + Wo, :]
            else:
                # Stride only on the outer (H) axis; subsample W via a reshape
                # instead of a strided sublane gather.
                rows = hp_ref[:, pl.ds(di, Ho, s), pl.ds(dj, Wo * s), :]
                patch = rows.reshape(nb, Ho, Wo, s, Cm_p)[:, :, :, 0, :]
            acc = acc + patch * wdw[di, dj]
    d = jnp.clip(acc, 0.0, 6.0)

    # ---- 1x1 projection conv (BN scale pre-folded) + bias ----
    out = jnp.dot(d.reshape(nb * Ho * Wo, Cm_p).astype(w_proj_ref.dtype),
                  w_proj_ref[...], preferred_element_type=jnp.float32)
    out = (out + b2_ref[...]).reshape(nb, Ho, Wo, Cout_p)

    if shortcut:
        out = out + x                                    # Cin_p == Cout_p here

    o_ref[...] = out.astype(o_ref.dtype)


def inverted_residual_forward(x_nchw, p, *, k=3, s=1, t=6, eps=1e-5,
                              block_n=1, compute_dtype=jnp.float32):
    """NCHW in/out wrapper; params in PyTorch layouts; kernel works in NHWC."""
    assert t != 1, "only the t != 1 (expansion) path is implemented (module default t=6)"
    N, Cin, H, W = x_nchw.shape
    Cm = p["w_exp"].shape[0]
    Cout = p["w_proj"].shape[0]
    pad = (k - 1) // 2
    Hp = H + 2 * pad
    Wp = W + 2 * pad
    Ho = (Hp - k) // s + 1
    Wo = (Wp - k) // s + 1
    # extra right-hand zero columns so the stride-s W subsample never reads OOB
    Wp_pad = max(Wp, (k - 1) + Wo * s)
    shortcut = (s == 1 and Cin == Cout)

    Cin_p = _round_up(Cin, _LANE)
    Cm_p = _round_up(Cm, _LANE)
    Cout_p = _round_up(Cout, _LANE)
    block_n = max(1, math.gcd(int(block_n), N))

    f32 = jnp.float32
    x = jnp.transpose(x_nchw, (0, 2, 3, 1)).astype(f32)                    # NHWC
    x = jnp.pad(x, ((0, 0), (0, 0), (0, 0), (0, Cin_p - Cin)))

    # fold inference BatchNorm into the 1x1 conv weights (scale) + per-channel bias
    s1 = p["gamma1"] / jnp.sqrt(p["var1"] + eps)                           # (Cm,)
    b1 = p["beta1"] - p["mean1"] * s1
    s2 = p["gamma2"] / jnp.sqrt(p["var2"] + eps)                           # (Cout,)
    b2 = p["beta2"] - p["mean2"] * s2

    w_exp = jnp.transpose(p["w_exp"][:, :, 0, 0], (1, 0)) * s1[None, :]    # (Cin, Cm)
    w_proj = jnp.transpose(p["w_proj"][:, :, 0, 0], (1, 0)) * s2[None, :]  # (Cm, Cout)
    w_dw = jnp.transpose(p["w_dw"][:, 0, :, :], (1, 2, 0))                 # (k, k, Cm)

    w_exp_p = jnp.pad(w_exp, ((0, Cin_p - Cin), (0, Cm_p - Cm))).astype(compute_dtype)
    w_proj_p = jnp.pad(w_proj, ((0, Cm_p - Cm), (0, Cout_p - Cout))).astype(compute_dtype)
    w_dw_p = jnp.pad(w_dw, ((0, 0), (0, 0), (0, Cm_p - Cm))).astype(f32)
    b1_p = jnp.pad(b1, (0, Cm_p - Cm)).reshape(1, Cm_p).astype(f32)
    b2_p = jnp.pad(b2, (0, Cout_p - Cout)).reshape(1, Cout_p).astype(f32)

    kernel = functools.partial(_inverted_residual_kernel,
                               k=k, s=s, pad=pad, shortcut=shortcut)

    # VMEM budget / cost hints
    isz = 4
    wisz = jnp.dtype(compute_dtype).itemsize
    x_blk = block_n * H * W * Cin_p * isz
    o_blk = block_n * Ho * Wo * Cout_p * isz
    scratch_bytes = block_n * Hp * Wp_pad * Cm_p * isz
    w_bytes = (Cin_p * Cm_p + Cm_p * Cout_p) * wisz \
        + (k * k * Cm_p + Cm_p + Cout_p) * isz
    vmem_bytes = 2 * (x_blk + o_blk) + scratch_bytes + 2 * w_bytes
    vmem_limit = int(min(max(4 * vmem_bytes, 32 * 1024 * 1024), 64 * 1024 * 1024))

    flops = (2 * N * H * W * Cin_p * Cm_p
             + 2 * N * k * k * Ho * Wo * Cm_p
             + 2 * N * Ho * Wo * Cm_p * Cout_p)
    bytes_accessed = int(N * H * W * Cin_p * isz
                         + N * Ho * Wo * Cout_p * isz + w_bytes)

    out = pl.pallas_call(
        kernel,
        out_shape=jax.ShapeDtypeStruct((N, Ho, Wo, Cout_p), jnp.float32),
        grid_spec=pltpu.PrefetchScalarGridSpec(
            num_scalar_prefetch=0,
            grid=(N // block_n,),
            in_specs=[
                pl.BlockSpec((block_n, H, W, Cin_p), lambda n: (n, 0, 0, 0)),
                pl.BlockSpec((Cin_p, Cm_p), lambda n: (0, 0)),     # expand weight
                pl.BlockSpec((1, Cm_p), lambda n: (0, 0)),         # BN1 bias
                pl.BlockSpec((k, k, Cm_p), lambda n: (0, 0, 0)),   # depthwise weight
                pl.BlockSpec((Cm_p, Cout_p), lambda n: (0, 0)),    # project weight
                pl.BlockSpec((1, Cout_p), lambda n: (0, 0)),       # BN2 bias
            ],
            out_specs=pl.BlockSpec((block_n, Ho, Wo, Cout_p),
                                   lambda n: (n, 0, 0, 0)),
            scratch_shapes=[pltpu.VMEM((block_n, Hp, Wp_pad, Cm_p), jnp.float32)],
        ),
        compiler_params=pltpu.CompilerParams(
            dimension_semantics=("parallel",),
            vmem_limit_bytes=vmem_limit),
        cost_estimate=pl.CostEstimate(flops=flops, transcendentals=0,
                                      bytes_accessed=bytes_accessed),
    )(x, w_exp_p, b1_p, w_dw_p, w_proj_p, b2_p)

    out = out[..., :Cout]                                # drop lane padding
    return jnp.transpose(out, (0, 3, 1, 2))              # back to NCHW


def init_params(key, in_c, out_c, k=3, t=6, alpha=1.0):
    """Deterministic synthetic parameters with the same shapes as the PyTorch module."""
    in_C = int(in_c * alpha)
    mid_C = int(in_c * alpha * t)
    out_C = int(out_c * alpha)
    ks = jax.random.split(key, 11)
    f32 = jnp.float32
    return {
        "w_exp":  0.1 * jax.random.normal(ks[0], (mid_C, in_C, 1, 1), f32),
        "w_dw":   0.1 * jax.random.normal(ks[1], (mid_C, 1, k, k), f32),
        "w_proj": 0.1 * jax.random.normal(ks[2], (out_C, mid_C, 1, 1), f32),
        "gamma1": 1.0 + 0.1 * jax.random.normal(ks[3], (mid_C,), f32),
        "beta1":  0.1 * jax.random.normal(ks[4], (mid_C,), f32),
        "mean1":  0.1 * jax.random.normal(ks[5], (mid_C,), f32),
        "var1":   1.0 + 0.1 * jnp.abs(jax.random.normal(ks[6], (mid_C,), f32)),
        "gamma2": 1.0 + 0.1 * jax.random.normal(ks[7], (out_C,), f32),
        "beta2":  0.1 * jax.random.normal(ks[8], (out_C,), f32),
        "mean2":  0.1 * jax.random.normal(ks[9], (out_C,), f32),
        "var2":   1.0 + 0.1 * jnp.abs(jax.random.normal(ks[10], (out_C,), f32)),
    }


def _ref_forward(x_nchw, p, *, k=3, s=1, eps=1e-5):
    """Pure-JAX/XLA reference (same math, independent conv implementation)."""
    dn = ("NCHW", "OIHW", "NCHW")
    x = x_nchw.astype(jnp.float32)
    Cin = x.shape[1]
    Cm = p["w_exp"].shape[0]
    Cout = p["w_proj"].shape[0]
    pad = (k - 1) // 2

    def bn(y, g, b, m, v):
        rs = lambda a: a.reshape(1, -1, 1, 1)
        return (y - rs(m)) / jnp.sqrt(rs(v) + eps) * rs(g) + rs(b)

    h = jax.lax.conv_general_dilated(x, p["w_exp"], (1, 1), "VALID",
                                     dimension_numbers=dn)
    h = jnp.clip(bn(h, p["gamma1"], p["beta1"], p["mean1"], p["var1"]), 0.0, 6.0)
    d = jax.lax.conv_general_dilated(h, p["w_dw"], (s, s),
                                     [(pad, pad), (pad, pad)],
                                     dimension_numbers=dn,
                                     feature_group_count=Cm)
    d = jnp.clip(d, 0.0, 6.0)
    o = jax.lax.conv_general_dilated(d, p["w_proj"], (1, 1), "VALID",
                                     dimension_numbers=dn)
    o = bn(o, p["gamma2"], p["beta2"], p["mean2"], p["var2"])
    if s == 1 and Cin == Cout:
        o = o + x
    return o


if __name__ == "__main__":
    # small shapes consistent with the module: in_c = out_c = 4, t = 6 -> middle_C = 24
    N, in_c, out_c, H, W = 2, 4, 4, 16, 16
    k, s, t = 3, 1, 6

    key = jax.random.PRNGKey(0)
    k_params, k_x = jax.random.split(key)
    params = init_params(k_params, in_c, out_c, k=k, t=t)
    x = jax.random.normal(k_x, (N, in_c, H, W), jnp.float32)

    ref = _ref_forward(x, params, k=k, s=s)

    # f32 matmuls, one image per grid step (exercises the batch grid axis)
    out = inverted_residual_forward(x, params, k=k, s=s, t=t,
                                    block_n=1, compute_dtype=jnp.float32)
    out = jax.block_until_ready(out)
    assert out.shape == ref.shape, (out.shape, ref.shape)
    assert jnp.allclose(out, ref, atol=1e-4, rtol=1e-4), \
        float(jnp.max(jnp.abs(out - ref)))

    # bf16 MXU matmuls (f32 accumulation), whole batch folded into one grid step
    out_bf16 = inverted_residual_forward(x, params, k=k, s=s, t=t,
                                         block_n=2, compute_dtype=jnp.bfloat16)
    out_bf16 = jax.block_until_ready(out_bf16)
    assert out_bf16.shape == ref.shape, (out_bf16.shape, ref.shape)
    assert jnp.allclose(out_bf16, ref, atol=2e-2, rtol=2e-2), \
        float(jnp.max(jnp.abs(out_bf16 - ref)))

    print("KERNEL_OK")
</pallas_src>

<mosaic_0001>
module attributes {stable_mosaic.version = 11 : i64} {
  func.func @_inverted_residual_kernel(%arg0: i32, %arg1: memref<1x16x16x128xf32, #tpu.memory_space<vmem>>, %arg2: memref<128x128xf32, #tpu.memory_space<vmem>>, %arg3: memref<1x128xf32, #tpu.memory_space<vmem>>, %arg4: memref<3x3x128xf32, #tpu.memory_space<vmem>>, %arg5: memref<128x128xf32, #tpu.memory_space<vmem>>, %arg6: memref<1x128xf32, #tpu.memory_space<vmem>>, %arg7: memref<1x16x16x128xf32, #tpu.memory_space<vmem>>, %arg8: memref<1x18x18x128xf32, #tpu.memory_space<vmem>>) attributes {dimension_semantics = [#tpu.dimension_semantics<parallel>], iteration_bounds = array<i64: 2>, scalar_prefetch = 0 : i64, scratch_operands = 1 : i64, tpu.core_type = #tpu.core_type<tc>, window_params = [{transform_indices = @transform_0, window_bounds = array<i64: 1, 16, 16, 128>}, {pipeline_mode = #tpu.pipeline_mode<synchronous>, transform_indices = @transform_1, window_bounds = array<i64: 128, 128>}, {pipeline_mode = #tpu.pipeline_mode<synchronous>, transform_indices = @transform_2, window_bounds = array<i64: 1, 128>}, {pipeline_mode = #tpu.pipeline_mode<synchronous>, transform_indices = @transform_3, window_bounds = array<i64: 3, 3, 128>}, {pipeline_mode = #tpu.pipeline_mode<synchronous>, transform_indices = @transform_4, window_bounds = array<i64: 128, 128>}, {pipeline_mode = #tpu.pipeline_mode<synchronous>, transform_indices = @transform_5, window_bounds = array<i64: 1, 128>}, {transform_indices = @transform_6, window_bounds = array<i64: 1, 16, 16, 128>}]} {
    %c0 = arith.constant 0 : index
    %c0_0 = arith.constant 0 : index
    %c0_1 = arith.constant 0 : index
    %c0_2 = arith.constant 0 : index
    %0 = vector.load %arg1[%c0, %c0_0, %c0_1, %c0_2] : memref<1x16x16x128xf32, #tpu.memory_space<vmem>>, vector<1x16x16x128xf32>
    %1 = vector.shape_cast %0 : vector<1x16x16x128xf32> to vector<256x128xf32>
    %c0_3 = arith.constant 0 : index
    %c0_4 = arith.constant 0 : index
    %2 = vector.load %arg2[%c0_3, %c0_4] : memref<128x128xf32, #tpu.memory_space<vmem>>, vector<128x128xf32>
    %cst = arith.constant dense<0.000000e+00> : vector<256x128xf32>
    %3 = tpu.matmul %1, %2, %cst {dimension_numbers = #tpu.dot_dimension_numbers<[1], [0], [0], [1], [0, 0, 1, 1], [], []>} : vector<256x128xf32>, vector<128x128xf32>, vector<256x128xf32> -> vector<256x128xf32>
    %c0_5 = arith.constant 0 : index
    %c0_6 = arith.constant 0 : index
    %4 = vector.load %arg3[%c0_5, %c0_6] : memref<1x128xf32, #tpu.memory_space<vmem>>, vector<1x128xf32>
    %5 = vector.broadcast %4 : vector<1x128xf32> to vector<256x128xf32>
    %6 = arith.addf %3, %5 : vector<256x128xf32>
    %cst_7 = arith.constant 0.000000e+00 : f32
    %cst_8 = arith.constant 6.000000e+00 : f32
    %7 = vector.broadcast %cst_7 : f32 to vector<256x128xf32>
    %8 = arith.maximumf %7, %6 : vector<256x128xf32>
    %9 = vector.broadcast %cst_8 : f32 to vector<256x128xf32>
    %10 = arith.minimumf %9, %8 : vector<256x128xf32>
    %11 = vector.shape_cast %10 : vector<256x128xf32> to vector<1x16x16x128xf32>
    %cst_9 = arith.constant 0.000000e+00 : f32
    %12 = vector.broadcast %cst_9 : f32 to vector<1x1x18x128xf32>
    %c0_10 = arith.constant 0 : index
    %c0_11 = arith.constant 0 : index
    %c0_12 = arith.constant 0 : index
    %c0_13 = arith.constant 0 : index
    %13 = vector.load %arg8[%c0_10, %c0_11, %c0_12, %c0_13] : memref<1x18x18x128xf32, #tpu.memory_space<vmem>>, vector<1x1x18x128xf32>
    tpu.vector_store %arg8[%c0_10, %c0_11, %c0_12, %c0_13], %12 {strides = array<i32>} : memref<1x18x18x128xf32, #tpu.memory_space<vmem>>, vector<1x1x18x128xf32>,
    %cst_14 = arith.constant 0.000000e+00 : f32
    %14 = vector.broadcast %cst_14 : f32 to vector<1x1x18x128xf32>
    %c0_15 = arith.constant 0 : index
    %c17 = arith.constant 17 : index
    %c0_16 = arith.constant 0 : index
    %c0_17 = arith.constant 0 : index
    %15 = vector.load %arg8[%c0_15, %c17, %c0_16, %c0_17] : memref<1x18x18x128xf32, #tpu.memory_space<vmem>>, vector<1x1x18x128xf32>
    tpu.vector_store %arg8[%c0_15, %c17, %c0_16, %c0_17], %14 {strides = array<i32>} : memref<1x18x18x128xf32, #tpu.memory_space<vmem>>, vector<1x1x18x128xf32>,
    %cst_18 = arith.constant 0.000000e+00 : f32
    %16 = vector.broadcast %cst_18 : f32 to vector<1x16x1x128xf32>
    %c0_19 = arith.constant 0 : index
    %c1 = arith.constant 1 : index
    %c0_20 = arith.constant 0 : index
    %c0_21 = arith.constant 0 : index
    %17 = vector.load %arg8[%c0_19, %c1, %c0_20, %c0_21] : memref<1x18x18x128xf32, #tpu.memory_space<vmem>>, vector<1x16x1x128xf32>
    tpu.vector_store %arg8[%c0_19, %c1, %c0_20, %c0_21], %16 {strides = array<i32>} : memref<1x18x18x128xf32, #tpu.memory_space<vmem>>, vector<1x16x1x128xf32>,
    %cst_22 = arith.constant 0.000000e+00 : f32
    %18 = vector.broadcast %cst_22 : f32 to vector<1x16x1x128xf32>
    %c0_23 = arith.constant 0 : index
    %c1_24 = arith.constant 1 : index
    %c17_25 = arith.constant 17 : index
    %c0_26 = arith.constant 0 : index
    %19 = vector.load %arg8[%c0_23, %c1_24, %c17_25, %c0_26] : memref<1x18x18x128xf32, #tpu.memory_space<vmem>>, vector<1x16x1x128xf32>
    tpu.vector_store %arg8[%c0_23, %c1_24, %c17_25, %c0_26], %18 {strides = array<i32>} : memref<1x18x18x128xf32, #tpu.memory_space<vmem>>, vector<1x16x1x128xf32>,
    %c0_27 = arith.constant 0 : index
    %c1_28 = arith.constant 1 : index
    %c1_29 = arith.constant 1 : index
    %c0_30 = arith.constant 0 : index
    %20 = vector.load %arg8[%c0_27, %c1_28, %c1_29, %c0_30] : memref<1x18x18x128xf32, #tpu.memory_space<vmem>>, vector<1x16x16x128xf32>
    tpu.vector_store %arg8[%c0_27, %c1_28, %c1_29, %c0_30], %11 {strides = array<i32>} : memref<1x18x18x128xf32, #tpu.memory_space<vmem>>, vector<1x16x16x128xf32>,
    %c0_31 = arith.constant 0 : index
    %c0_32 = arith.constant 0 : index
    %c0_33 = arith.constant 0 : index
    %21 = vector.load %arg4[%c0_31, %c0_32, %c0_33] : memref<3x3x128xf32, #tpu.memory_space<vmem>>, vector<3x3x128xf32>
    %cst_34 = arith.constant 0.000000e+00 : f32
    %22 = vector.broadcast %cst_34 : f32 to vector<1x16x16x128xf32>
    %c0_35 = arith.constant 0 : index
    %c0_36 = arith.constant 0 : index
    %c0_37 = arith.constant 0 : index
    %c0_38 = arith.constant 0 : index
    %23 = vector.load %arg8[%c0_35, %c0_36, %c0_37, %c0_38] : memref<1x18x18x128xf32, #tpu.memory_space<vmem>>, vector<1x16x16x128xf32>
    %24 = vector.extract_strided_slice %21 {offsets = [0, 0, 0], sizes = [1, 1, 128], strides = [1, 1, 1]} : vector<3x3x128xf32> to vector<1x1x128xf32>
    %25 = vector.shape_cast %24 : vector<1x1x128xf32> to vector<128xf32>
    %26 = vector.shape_cast %25 : vector<128xf32> to vector<1x1x1x128xf32>
    %27 = vector.broadcast %26 : vector<1x1x1x128xf32> to vector<1x16x16x128xf32>
    %28 = arith.mulf %23, %27 : vector<1x16x16x128xf32>
    %29 = arith.addf %22, %28 : vector<1x16x16x128xf32>
    %c0_39 = arith.constant 0 : index
    %c0_40 = arith.constant 0 : index
    %c1_41 = arith.constant 1 : index
    %c0_42 = arith.constant 0 : index
    %30 = vector.load %arg8[%c0_39, %c0_40, %c1_41, %c0_42] : memref<1x18x18x128xf32, #tpu.memory_space<vmem>>, vector<1x16x16x128xf32>
    %31 = vector.extract_strided_slice %21 {offsets = [0, 1, 0], sizes = [1, 1, 128], strides = [1, 1, 1]} : vector<3x3x128xf32> to vector<1x1x128xf32>
    %32 = vector.shape_cast %31 : vector<1x1x128xf32> to vector<128xf32>
    %33 = vector.shape_cast %32 : vector<128xf32> to vector<1x1x1x128xf32>
    %34 = vector.broadcast %33 : vector<1x1x1x128xf32> to vector<1x16x16x128xf32>
    %35 = arith.mulf %30, %34 : vector<1x16x16x128xf32>
    %36 = arith.addf %29, %35 : vector<1x16x16x128xf32>
    %c0_43 = arith.constant 0 : index
    %c0_44 = arith.constant 0 : index
    %c2 = arith.constant 2 : index
    %c0_45 = arith.constant 0 : index
    %37 = vector.load %arg8[%c0_43, %c0_44, %c2, %c0_45] : memref<1x18x18x128xf32, #tpu.memory_space<vmem>>, vector<1x16x16x128xf32>
    %38 = vector.extract_strided_slice %21 {offsets = [0, 2, 0], sizes = [1, 1, 128], strides = [1, 1, 1]} : vector<3x3x128xf32> to vector<1x1x128xf32>
    %39 = vector.shape_cast %38 : vector<1x1x128xf32> to vector<128xf32>
    %40 = vector.shape_cast %39 : vector<128xf32> to vector<1x1x1x128xf32>
    %41 = vector.broadcast %40 : vector<1x1x1x128xf32> to vector<1x16x16x128xf32>
    %42 = arith.mulf %37, %41 : vector<1x16x16x128xf32>
    %43 = arith.addf %36, %42 : vector<1x16x16x128xf32>
    %c0_46 = arith.constant 0 : index
    %c1_47 = arith.constant 1 : index
    %c0_48 = arith.constant 0 : index
    %c0_49 = arith.constant 0 : index
    %44 = vector.load %arg8[%c0_46, %c1_47, %c0_48, %c0_49] : memref<1x18x18x128xf32, #tpu.memory_space<vmem>>, vector<1x16x16x128xf32>
    %45 = vector.extract_strided_slice %21 {offsets = [1, 0, 0], sizes = [1, 1, 128], strides = [1, 1, 1]} : vector<3x3x128xf32> to vector<1x1x128xf32>
    %46 = vector.shape_cast %45 : vector<1x1x128xf32> to vector<128xf32>
    %47 = vector.shape_cast %46 : vector<128xf32> to vector<1x1x1x128xf32>
    %48 = vector.broadcast %47 : vector<1x1x1x128xf32> to vector<1x16x16x128xf32>
    %49 = arith.mulf %44, %48 : vector<1x16x16x128xf32>
    %50 = arith.addf %43, %49 : vector<1x16x16x128xf32>
    %c0_50 = arith.constant 0 : index
    %c1_51 = arith.constant 1 : index
    %c1_52 = arith.constant 1 : index
    %c0_53 = arith.constant 0 : index
    %51 = vector.load %arg8[%c0_50, %c1_51, %c1_52, %c0_53] : memref<1x18x18x128xf32, #tpu.memory_space<vmem>>, vector<1x16x16x128xf32>
    %52 = vector.extract_strided_slice %21 {offsets = [1, 1, 0], sizes = [1, 1, 128], strides = [1, 1, 1]} : vector<3x3x128xf32> to vector<1x1x128xf32>
    %53 = vector.shape_cast %52 : vector<1x1x128xf32> to vector<128xf32>
    %54 = vector.shape_cast %53 : vector<128xf32> to vector<1x1x1x128xf32>
    %55 = vector.broadcast %54 : vector<1x1x1x128xf32> to vector<1x16x16x128xf32>
    %56 = arith.mulf %51, %55 : vector<1x16x16x128xf32>
    %57 = arith.addf %50, %56 : vector<1x16x16x128xf32>
    %c0_54 = arith.constant 0 : index
    %c1_55 = arith.constant 1 : index
    %c2_56 = arith.constant 2 : index
    %c0_57 = arith.constant 0 : index
    %58 = vector.load %arg8[%c0_54, %c1_55, %c2_56, %c0_57] : memref<1x18x18x128xf32, #tpu.memory_space<vmem>>, vector<1x16x16x128xf32>
    %59 = vector.extract_strided_slice %21 {offsets = [1, 2, 0], sizes = [1, 1, 128], strides = [1, 1, 1]} : vector<3x3x128xf32> to vector<1x1x128xf32>
    %60 = vector.shape_cast %59 : vector<1x1x128xf32> to vector<128xf32>
    %61 = vector.shape_cast %60 : vector<128xf32> to vector<1x1x1x128xf32>
    %62 = vector.broadcast %61 : vector<1x1x1x128xf32> to vector<1x16x16x128xf32>
    %63 = arith.mulf %58, %62 : vector<1x16x16x128xf32>
    %64 = arith.addf %57, %63 : vector<1x16x16x128xf32>
    %c0_58 = arith.constant 0 : index
    %c2_59 = arith.constant 2 : index
    %c0_60 = arith.constant 0 : index
    %c0_61 = arith.constant 0 : index
    %65 = vector.load %arg8[%c0_58, %c2_59, %c0_60, %c0_61] : memref<1x18x18x128xf32, #tpu.memory_space<vmem>>, vector<1x16x16x128xf32>
    %66 = vector.extract_strided_slice %21 {offsets = [2, 0, 0], sizes = [1, 1, 128], strides = [1, 1, 1]} : vector<3x3x128xf32> to vector<1x1x128xf32>
    %67 = vector.shape_cast %66 : vector<1x1x128xf32> to vector<128xf32>
    %68 = vector.shape_cast %67 : vector<128xf32> to vector<1x1x1x128xf32>
    %69 = vector.broadcast %68 : vector<1x1x1x128xf32> to vector<1x16x16x128xf32>
    %70 = arith.mulf %65, %69 : vector<1x16x16x128xf32>
    %71 = arith.addf %64, %70 : vector<1x16x16x128xf32>
    %c0_62 = arith.constant 0 : index
    %c2_63 = arith.constant 2 : index
    %c1_64 = arith.constant 1 : index
    %c0_65 = arith.constant 0 : index
    %72 = vector.load %arg8[%c0_62, %c2_63, %c1_64, %c0_65] : memref<1x18x18x128xf32, #tpu.memory_space<vmem>>, vector<1x16x16x128xf32>
    %73 = vector.extract_strided_slice %21 {offsets = [2, 1, 0], sizes = [1, 1, 128], strides = [1, 1, 1]} : vector<3x3x128xf32> to vector<1x1x128xf32>
    %74 = vector.shape_cast %73 : vector<1x1x128xf32> to vector<128xf32>
    %75 = vector.shape_cast %74 : vector<128xf32> to vector<1x1x1x128xf32>
    %76 = vector.broadcast %75 : vector<1x1x1x128xf32> to vector<1x16x16x128xf32>
    %77 = arith.mulf %72, %76 : vector<1x16x16x128xf32>
    %78 = arith.addf %71, %77 : vector<1x16x16x128xf32>
    %c0_66 = arith.constant 0 : index
    %c2_67 = arith.constant 2 : index
    %c2_68 = arith.constant 2 : index
    %c0_69 = arith.constant 0 : index
    %79 = vector.load %arg8[%c0_66, %c2_67, %c2_68, %c0_69] : memref<1x18x18x128xf32, #tpu.memory_space<vmem>>, vector<1x16x16x128xf32>
    %80 = vector.extract_strided_slice %21 {offsets = [2, 2, 0], sizes = [1, 1, 128], strides = [1, 1, 1]} : vector<3x3x128xf32> to vector<1x1x128xf32>
    %81 = vector.shape_cast %80 : vector<1x1x128xf32> to vector<128xf32>
    %82 = vector.shape_cast %81 : vector<128xf32> to vector<1x1x1x128xf32>
    %83 = vector.broadcast %82 : vector<1x1x1x128xf32> to vector<1x16x16x128xf32>
    %84 = arith.mulf %79, %83 : vector<1x16x16x128xf32>
    %85 = arith.addf %78, %84 : vector<1x16x16x128xf32>
    %cst_70 = arith.constant 0.000000e+00 : f32
    %cst_71 = arith.constant 6.000000e+00 : f32
    %86 = vector.broadcast %cst_70 : f32 to vector<1x16x16x128xf32>
    %87 = arith.maximumf %86, %85 : vector<1x16x16x128xf32>
    %88 = vector.broadcast %cst_71 : f32 to vector<1x16x16x128xf32>
    %89 = arith.minimumf %88, %87 : vector<1x16x16x128xf32>
    %90 = vector.shape_cast %89 : vector<1x16x16x128xf32> to vector<256x128xf32>
    %c0_72 = arith.constant 0 : index
    %c0_73 = arith.constant 0 : index
    %91 = vector.load %arg5[%c0_72, %c0_73] : memref<128x128xf32, #tpu.memory_space<vmem>>, vector<128x128xf32>
    %cst_74 = arith.constant dense<0.000000e+00> : vector<256x128xf32>
    %92 = tpu.matmul %90, %91, %cst_74 {dimension_numbers = #tpu.dot_dimension_numbers<[1], [0], [0], [1], [0, 0, 1, 1], [], []>} : vector<256x128xf32>, vector<128x128xf32>, vector<256x128xf32> -> vector<256x128xf32>
    %c0_75 = arith.constant 0 : index
    %c0_76 = arith.constant 0 : index
    %93 = vector.load %arg6[%c0_75, %c0_76] : memref<1x128xf32, #tpu.memory_space<vmem>>, vector<1x128xf32>
    %94 = vector.broadcast %93 : vector<1x128xf32> to vector<256x128xf32>
    %95 = arith.addf %92, %94 : vector<256x128xf32>
    %96 = vector.shape_cast %95 : vector<256x128xf32> to vector<1x16x16x128xf32>
    %97 = arith.addf %96, %0 : vector<1x16x16x128xf32>
    %c0_77 = arith.constant 0 : index
    %c0_78 = arith.constant 0 : index
    %c0_79 = arith.constant 0 : index
    %c0_80 = arith.constant 0 : index
    %98 = vector.load %arg7[%c0_77, %c0_78, %c0_79, %c0_80] : memref<1x16x16x128xf32, #tpu.memory_space<vmem>>, vector<1x16x16x128xf32>
    tpu.vector_store %arg7[%c0_77, %c0_78, %c0_79, %c0_80], %97 {strides = array<i32>} : memref<1x16x16x128xf32, #tpu.memory_space<vmem>>, vector<1x16x16x128xf32>,
    return
  }
  func.func @transform_0(%arg0: i32) -> (i32, i32, i32, i32) {
    %c0_i32 = arith.constant 0 : i32
    %c0_i32_0 = arith.constant 0 : i32
    %c0_i32_1 = arith.constant 0 : i32
    %c0_i32_2 = arith.constant 0 : i32
    return %arg0, %c0_i32, %c0_i32_0, %c0_i32_1 : i32, i32, i32, i32
  }
  func.func @transform_1(%arg0: i32) -> (i32, i32) {
    %c0_i32 = arith.constant 0 : i32
    %c0_i32_0 = arith.constant 0 : i32
    %c0_i32_1 = arith.constant 0 : i32
    return %c0_i32, %c0_i32_0 : i32, i32
  }
  func.func @transform_2(%arg0: i32) -> (i32, i32) {
    %c0_i32 = arith.constant 0 : i32
    %c0_i32_0 = arith.constant 0 : i32
    %c0_i32_1 = arith.constant 0 : i32
    return %c0_i32, %c0_i32_0 : i32, i32
  }
  func.func @transform_3(%arg0: i32) -> (i32, i32, i32) {
    %c0_i32 = arith.constant 0 : i32
    %c0_i32_0 = arith.constant 0 : i32
    %c0_i32_1 = arith.constant 0 : i32
    %c0_i32_2 = arith.constant 0 : i32
    return %c0_i32, %c0_i32_0, %c0_i32_1 : i32, i32, i32
  }
  func.func @transform_4(%arg0: i32) -> (i32, i32) {
    %c0_i32 = arith.constant 0 : i32
    %c0_i32_0 = arith.constant 0 : i32
    %c0_i32_1 = arith.constant 0 : i32
    return %c0_i32, %c0_i32_0 : i32, i32
  }
  func.func @transform_5(%arg0: i32) -> (i32, i32) {
    %c0_i32 = arith.constant 0 : i32
    %c0_i32_0 = arith.constant 0 : i32
    %c0_i32_1 = arith.constant 0 : i32
    return %c0_i32, %c0_i32_0 : i32, i32
  }
  func.func @transform_6(%arg0: i32) -> (i32, i32, i32, i32) {
    %c0_i32 = arith.constant 0 : i32
    %c0_i32_0 = arith.constant 0 : i32
    %c0_i32_1 = arith.constant 0 : i32
    %c0_i32_2 = arith.constant 0 : i32
    return %arg0, %c0_i32, %c0_i32_0, %c0_i32_1 : i32, i32, i32, i32
  }
}

</mosaic_0001>

<bundles_post_ra>
// kernel: tpu_custom_call.1
= control target key start
LH: loop header
LB: loop body
LE: loop exit
PB: predicated region body
PF: predicated region fallthrough
CT: control target
= control target key end

     0   :  { %11 = vsyncpa [#allocation4], 0  ;;  %s3395_s0 = inlined_call_operand.hbm [shape: f32[2,16,16,128], index: 0, kind: input, shape index: {}]   ;;  %s3396_s1 = inlined_call_operand.hbm [shape: f32[128,128], index: 1, kind: input, shape index: {}]   ;;  %s3397_s2 = inlined_call_operand.vmem [shape: f32[1,128], index: 2, kind: input, shape index: {}]   ;;  %s3398_s3 = inlined_call_operand.hbm [shape: f32[3,3,128], index: 3, kind: input, shape index: {}]   ;;  %s3399_s4 = inlined_call_operand.hbm [shape: f32[128,128], index: 4, kind: input, shape index: {}]   ;;  %s3400_s5 = inlined_call_operand.vmem [shape: f32[1,128], index: 5, kind: input, shape index: {}]   ;;  %s3401_s6 = inlined_call_operand.hbm [shape: f32[2,16,16,128], index: 6, kind: output, shape index: {}]  }
   0x1   :  { %13 = vsyncpa [#allocation4 + $0x1], 0 }
   0x2   :  { %14 = vsyncpa [#allocation7], 0 }
   0x3   :  { %15 = vsyncpa [#allocation10], 0 }
   0x4   :  { %16 = vsyncpa [#allocation5], 0 }
   0x5   :  { %18 = vsyncpa [#allocation5 + $0x1], 0  ;;  %s2294_s21 = smov 0   ;;  %s2296_s22 = smov 0  }
   0x6   :  { %s2298_s23 = smov 0   ;;  %s2300_s24 = smov 0  }
   0x7 LB: > { %s2315_s25 = sadd.s32 4294967295, %s2247_s24   ;;  %s1879_s26 = sadd.s32 4294967294, %s2247_s24   ;;  %s2247_s24 = sphi %s2300_s24, %s3466_s24   ;;  %s2243_s23 = sphi %s2298_s23, %s3465_s23   ;;  %s2239_s22 = sphi %s2296_s22, %s3464_s22   ;;  %s2235_s21 = sphi %s2294_s21, %s3463_s21  }
   0x8   : > { %p44_p0 = scmp.ne.s32.totalorder %s2239_s22, %s2235_s21  ;;  %p45_p1 = scmp.eq.s32.totalorder %s2315_s25, 0 }
   0x9   : > { %p173_p2 = scmp.eq.s32.totalorder %s2315_s25, 1  ;;  %p179_p3 = scmp.eq.s32.totalorder %s1879_s26, 1 }
   0xa   : > { %p2324_p4 = por %p45_p1, %p44_p0  ;;  %p1880_p5 = scmp.ge.s32.totalorder %s2247_s24, 1 }
   0xb   : > { %p2329_p6 = por %p179_p3, %p44_p0  ;;  %p186_p7 = scmp.lt.s32.totalorder %s2247_s24, 3 }
   0xc   : > { %s197_s7 = sshll.u32 %s3396_s1, 4  ;;  %s2249_s9 = smov [#allocation6]   ;;  %s198_s7 = int_to_ptr.hbm [resolvable:$true] %s197_s7 }
   0xd   : > { %p2337_p8 = pnand %p1880_p5, %p186_p7  ;;  %s199_s10 = sshll.u32 %s2249_s9, 4  ;;  %s200_s10 = int_to_ptr.vmem [resolvable:$true] %s199_s10 }
   0xe   : > { %s214_s14 = sshll.u32 %s3398_s3, 4  ;;  %s3402_s15 = smov 128   ;;  %s215_s14 = int_to_ptr.hbm [resolvable:$true] %s214_s14 }
   0xf   : > { %p1949_p9 = pneg %p2337_p8  ;;  %s3403_s16 = smov 8  }
  0x10   : > { %s2252_s17 = smov [#allocation8]   ;;  %s2253_s19 = smov 64  }
  0x11   : > { %p2345_p10 = pnand %p1949_p9, %p45_p1  ;;  %s216_s18 = sshll.u32 %s2252_s17, 4  ;;  %s217_s18 = int_to_ptr.vmem [resolvable:$true] %s216_s18 }
  0x12   : > { %s2254_s20 = smov 4   ;;  %s228_s30 = sshll.u32 %s3399_s4, 4  ;;  %s229_s30 = int_to_ptr.hbm [resolvable:$true] %s228_s30 }
  0x13   : > { %1952 = dma.hbm_to_vmem [thread:$0]  (!%p2345_p10), %s198_s7, 2048, %s200_s10, [#allocation7], %s3402_s15, %s3402_s15, %s3403_s16  }
  0x14   : > { %1955 = dma.hbm_to_vmem [thread:$0]  (!%p2345_p10), %s215_s14, 192, %s217_s18, [#allocation7], %s2253_s19, %s2253_s19, %s2254_s20  }
  0x15   : > { %s2255_s7 = smov [#allocation9]   ;;  %s2369_s10 = sadd.s32 1, %s2247_s24  }
  0x16   : > { %s230_s9 = sshll.u32 %s2255_s7, 4  ;;  %s28_s12 = ssub.s32 %s2247_s24, %s2369_s10  ;;  %s231_s9 = int_to_ptr.vmem [resolvable:$true] %s230_s9 }
  0x17   : > { %1958 = dma.hbm_to_vmem [thread:$0]  (!%p2345_p10), %s229_s30, 2048, %s231_s9, [#allocation10], %s3402_s15, %s3402_s15, %s3403_s16  }
  0x18   : > { %s31_s13 = sadd.s32 1, %s2243_s23  ;;  %p29_p12 = scmp.eq.s32.totalorder %s28_s12, 0 }
  0x19   : > { %p38_p13 = scmp.ne.s32.totalorder %s2243_s23, %s2239_s22  ;;  %p39_p0 = scmp.eq.s32.totalorder %s2247_s24, 0 }
  0x1a   : > { %s2378_s14 = scalar_select %p29_p12, %s2243_s23, %s31_s13  }
  0x1b   : > { %p2382_p3 = por %p173_p2, %p38_p13  ;;  %p1970_p5 = scmp.lt.s32.totalorder %s2247_s24, 2 }
  0x1c   : > { %s247_s11 = sand.u32 1, %s2243_s23   ;;  %s1899_s18 = sshll.u32 %s2247_s24, 8 }
  0x1d   : > { %p40_p7 = por %p39_p0, %p38_p13  ;;  %s1885_s19 = sshll.u32 %s247_s11, 8 }
  0x1e   : > { %s256_s29 = scalar_lea.hbm %s3395_s0, %s1899_s18  ;;  %s251_s7 = scalar_lea.vmem [#allocation3], %s1885_s19 }
  0x1f   : > { %s257_s30 = sshll.u32 %s256_s29, 4  ;;  %s259_s9 = sshll.u32 %s251_s7, 4  ;;  %s258_s30 = int_to_ptr.hbm [resolvable:$true] %s257_s30  ;;  %s260_s9 = int_to_ptr.vmem [resolvable:$true] %s259_s9 }
  0x20   : > { %p2392_p9 = pnand %p1970_p5, %p40_p7  ;;  %s248_s13 = scalar_lea.sflag [#allocation4], %s247_s11 }
  0x21   : > { %s2143_s15 = sshra.s32 %s258_s30, 4  ;;  %s2150_s19 = scalar_lea.hbm %s3395_s0, 512  ;;  %s2144_s15 = int_to_ptr.hbm [resolvable:$true] %s2143_s15 }
  0x22   : > { %s2145_s16 = scalar_lea.hbm %s2144_s15, 256  ;;  %p2147_p10 = pneg %p2392_p9 }
  0x23   : > { %p2146_p2 = scmp.ne.s32.totalorder %s2144_s15, %s2145_s16  ;;  %p2151_p0 = scmp.lt.s32.totalorder %s2144_s15, %s3395_s0 }
  0x24   : > { %p2152_p5 = scmp.lt.s32.totalorder %s2150_s19, %s2145_s16 }
  0x25   : > { %p2148_p12 = pnand %p2147_p10, %p2146_p2 }
  0x26   : > { %p2153_p7 = por %p2152_p5, %p2151_p0 }
  0x27   : > { %p2149_p13 = pneg %p2148_p12 }
  0x29   : > { %p2154_p11 = pnand %p2153_p7, %p2149_p13 }
  0x2b   : > { %2157 = shalt.err (!%p2154_p11)
}
  0x2c   : > { %s3426_s11 = smov 8   ;;  %s3427_s7 = smov 128  }
  0x2d   : > { %1962 = dma.hbm_to_vmem [thread:$0]  (!%p2392_p9), %s258_s30, 4096, %s260_s9, %s248_s13, %s3427_s7, %s3427_s7, %s3426_s11  }
  0x2e   : > { %271 = sbr.rel (%p2337_p8) target bundleno = 631 (0x277), region = 44 }
  0x33   : > { %s2412_s18 = sand.u32 1, %s2239_s22  }
  0x34   : > { %s1889_s15 = sshll.u32 %s2412_s18, 8  ;;  %s274_s16 = scalar_lea.sflag [#allocation4], %s2412_s18 }
  0x35   : > { %s2418_s20 = scalar_lea.vmem [#allocation3], %s1889_s15 }
  0x36   : > { %2218 = dma.done.wait (%p2324_p4), %s274_s16, 4096  }
  0x37   : > { %2220 = vsyncadd (%p2324_p4), %s274_s16, 4294963200 }
  0x38   : > { %2222 = dma.done.wait (%p45_p1), [#allocation7], 2240  }
  0x39   : > { %2224 = vsyncadd (%p45_p1), [#allocation7], 4294965056 }
  0x3a   : > { %2226 = dma.done.wait (%p45_p1), [#allocation10], 2048  }
  0x3b   : > { %2228 = vsyncadd (%p45_p1), [#allocation10], 4294965248  ;;  %v369_v0 = vld [vmem:[#allocation6 + $0x78] sm:$0xff]  ;;  %v368_v1 = vld [vmem:[#allocation6 + $0x70] sm:$0xff]  ;;  %v2256_v37 = vmov 0.0   ;;  %s3106_s19 = scalar_lea.vmem [#allocation11], %s1889_s15 }
  0x3c   : > { %374 = vmatpush.msra.mxu0 %v369_v0  ;;  %1901 = vmatpush.msra.mxu2 %v369_v0  ;;  %v367_v2 = vld [vmem:[#allocation6 + $0x68] sm:$0xff]  ;;  %v366_v3 = vld [vmem:[#allocation6 + $0x60] sm:$0xff]  ;;  %v365_v4 = vld [vmem:[#allocation6 + $0x58] sm:$0xff]  ;;  %551 = vst [vmem:[#allocation2] sm:$0xff] %v2256_v37  ;;  %s1900_s26 = sshll.u32 %s2315_s25, 8  ;;  %s1774_s15 = sshll.u32 %s3106_s19, 4  ;;  %s1775_s15 = int_to_ptr.vmem [resolvable:$true] %s1774_s15 }
  0x3d   : > { %v364_v5 = vld [vmem:[#allocation6 + $0x50] sm:$0xff]  ;;  %v363_v6 = vld [vmem:[#allocation6 + $0x48] sm:$0xff]  ;;  %v362_v7 = vld [vmem:[#allocation6 + $0x40] sm:$0xff]  ;;  %552 = vst [vmem:[#allocation2 + $0x8] sm:$0xff] %v2256_v37  ;;  %s1773_s7 = scalar_lea.hbm %s3401_s6, %s1900_s26  ;;  %s1762_s27 = scalar_lea.sflag [#allocation5], %s2412_s18 }
  0x3e   : > { %375 = vmatpush.msra.mxu0 %v368_v1  ;;  %1902 = vmatpush.msra.mxu2 %v368_v1  ;;  %v361_v8 = vld [vmem:[#allocation6 + $0x38] sm:$0xff]  ;;  %v360_v9 = vld [vmem:[#allocation6 + $0x30] sm:$0xff]  ;;  %v359_v10 = vld [vmem:[#allocation6 + $0x28] sm:$0xff]  ;;  %559 = vst [vmem:[#allocation2 + $0x18] sm:$0x1] %v2256_v37  ;;  %s1776_s16 = sshll.u32 %s1773_s7, 4  ;;  %s1777_s16 = int_to_ptr.hbm [resolvable:$true] %s1776_s16 }
  0x3f   : > { %v358_v11 = vld [vmem:[#allocation6 + $0x20] sm:$0xff]  ;;  %v357_v12 = vld [vmem:[#allocation6 + $0x18] sm:$0xff]  ;;  %v356_v13 = vld [vmem:[#allocation6 + $0x10] sm:$0xff]  ;;  %560 = vst [vmem:[#allocation2 + $0x30] sm:$0x1] %v2256_v37  ;;  %s2187_s25 = sshra.s32 %s1777_s16, 4  ;;  %s2188_s25 = int_to_ptr.hbm [resolvable:$true] %s2187_s25 }
  0x40   : > { %376 = vmatpush.msra.mxu0 %v367_v2  ;;  %1903 = vmatpush.msra.mxu2 %v367_v2  ;;  %v355_v14 = vld [vmem:[#allocation6 + $0x8] sm:$0xff]  ;;  %v354_v15 = vld [vmem:[#allocation6] sm:$0xff]  ;;  %v324_v18 = vld [vmem:[%s2418_s20 + $0x10] sm:$0xff]  ;;  %553 = vst [vmem:[#allocation2 + $0x10] sm:$0x3] %v2256_v37  ;;  %s2189_s8 = scalar_lea.hbm %s2188_s25, 256  ;;  %p2194_p11 = scmp.lt.s32.totalorder %s2188_s25, %s3401_s6 }
  0x41   : > { %v322_v16 = vld [vmem:[%s2418_s20] sm:$0xff]  ;;  %v323_v17 = vld [vmem:[%s2418_s20 + $0x8] sm:$0xff]  ;;  %v325_v19 = vld [vmem:[%s2418_s20 + $0x18] sm:$0xff]  ;;  %555 = vst [vmem:[#allocation2 + $0x198] sm:$0xff] %v2256_v37  ;;  %p2190_p1 = scmp.ne.s32.totalorder %s2188_s25, %s2189_s8  ;;  %s2193_s12 = scalar_lea.hbm %s3401_s6, 512 }
  0x42   : > { %377 = vmatpush.msra.mxu0 %v366_v3  ;;  %1904 = vmatpush.msra.mxu2 %v366_v3  ;;  %v326_v20 = vld [vmem:[%s2418_s20 + $0x20] sm:$0xff]  ;;  %v327_v22 = vld [vmem:[%s2418_s20 + $0x28] sm:$0xff]  ;;  %v328_v24 = vld [vmem:[%s2418_s20 + $0x30] sm:$0xff]  ;;  %556 = vst [vmem:[#allocation2 + $0x1a0] sm:$0xff] %v2256_v37  ;;  %p2195_p9 = scmp.lt.s32.totalorder %s2193_s12, %s2189_s8 }
  0x43   : > { %v338_v21 = vld [vmem:[%s2418_s20 + $0x80] sm:$0xff]  ;;  %v339_v23 = vld [vmem:[%s2418_s20 + $0x88] sm:$0xff]  ;;  %v340_v25 = vld [vmem:[%s2418_s20 + $0x90] sm:$0xff]  ;;  %557 = vst [vmem:[#allocation2 + $0x1a8] sm:$0x3] %v2256_v37  ;;  %p2191_p4 = pnand %p2190_p1, %p2382_p3 }
  0x44   : > { %378 = vmatpush.msra.mxu0 %v365_v4  ;;  %1905 = vmatpush.msra.mxu2 %v365_v4  ;;  %v329_v26 = vld [vmem:[%s2418_s20 + $0x38] sm:$0xff]  ;;  %v330_v28 = vld [vmem:[%s2418_s20 + $0x40] sm:$0xff]  ;;  %v331_v30 = vld [vmem:[%s2418_s20 + $0x48] sm:$0xff]  ;;  %561 = vst [vmem:[#allocation2 + $0x48] sm:$0x1] %v2256_v37  ;;  %p2196_p2 = por %p2195_p9, %p2194_p11 }
  0x45   : > { %v341_v27 = vld [vmem:[%s2418_s20 + $0x98] sm:$0xff]  ;;  %v342_v29 = vld [vmem:[%s2418_s20 + $0xa0] sm:$0xff]  ;;  %v343_v31 = vld [vmem:[%s2418_s20 + $0xa8] sm:$0xff]  ;;  %562 = vst [vmem:[#allocation2 + $0x60] sm:$0x1] %v2256_v37  ;;  %p2192_p8 = pneg %p2191_p4 }
  0x46   : > { %379 = vmatpush.msra.mxu0 %v364_v5  ;;  %1906 = vmatpush.msra.mxu2 %v364_v5  ;;  %v332_v32 = vld [vmem:[%s2418_s20 + $0x50] sm:$0xff]  ;;  %v333_v34 = vld [vmem:[%s2418_s20 + $0x58] sm:$0xff]  ;;  %v334_v36 = vld [vmem:[%s2418_s20 + $0x60] sm:$0xff]  ;;  %563 = vst [vmem:[#allocation2 + $0x78] sm:$0x1] %v2256_v37 }
  0x47   : > { %v344_v33 = vld [vmem:[%s2418_s20 + $0xb0] sm:$0xff]  ;;  %v345_v35 = vld [vmem:[%s2418_s20 + $0xb8] sm:$0xff]  ;;  %v346_v38 = vld [vmem:[%s2418_s20 + $0xc0] sm:$0xff]  ;;  %564 = vst [vmem:[#allocation2 + $0x90] sm:$0x1] %v2256_v37  ;;  %p2197_p10 = pnand %p2196_p2, %p2192_p8 }
  0x48   : > { %380 = vmatpush.msra.mxu0 %v363_v6  ;;  %1907 = vmatpush.msra.mxu2 %v363_v6  ;;  %v335_v39 = vld [vmem:[%s2418_s20 + $0x68] sm:$0xff]  ;;  %565 = vst [vmem:[#allocation2 + $0xa8] sm:$0x1] %v2256_v37  ;;  %v336_v42 = vld [vmem:[%s2418_s20 + $0x70] sm:$0xff]  ;;  %v1578_v43 = vld [vmem:[#allocation9 + $0x70] sm:$0xff] }
  0x49   : > { %v347_v40 = vld [vmem:[%s2418_s20 + $0xc8] sm:$0xff]  ;;  %566 = vst [vmem:[#allocation2 + $0xc0] sm:$0x1] %v2256_v37  ;;  %v1577_v44 = vld [vmem:[#allocation9 + $0x68] sm:$0xff]  ;;  %v1574_v49 = vld [vmem:[#allocation9 + $0x50] sm:$0xff] }
  0x4a   : > { %381 = vmatpush.msra.mxu0 %v362_v7  ;;  %1908 = vmatpush.msra.mxu2 %v362_v7  ;;  %v1579_v41 = vld [vmem:[#allocation9 + $0x78] sm:$0xff]  ;;  %567 = vst [vmem:[#allocation2 + $0xd8] sm:$0x1] %v2256_v37  ;;  %v1576_v45 = vld [vmem:[#allocation9 + $0x60] sm:$0xff]  ;;  %v337_v48 = vld [vmem:[%s2418_s20 + $0x78] sm:$0xff] }
  0x4b   : > { %1584 = vmatpush.msra.mxu1 %v1579_v41  ;;  %1917 = vmatpush.msra.mxu3 %v1579_v41  ;;  %568 = vst [vmem:[#allocation2 + $0xf0] sm:$0x1] %v2256_v37  ;;  %v348_v46 = vld [vmem:[%s2418_s20 + $0xd0] sm:$0xff]  ;;  %v1575_v47 = vld [vmem:[#allocation9 + $0x58] sm:$0xff]  ;;  %v349_v53 = vld [vmem:[%s2418_s20 + $0xd8] sm:$0xff] }
  0x4c   : > { %382 = vmatpush.msra.mxu0 %v361_v8  ;;  %1909 = vmatpush.msra.mxu2 %v361_v8  ;;  %569 = vst [vmem:[#allocation2 + $0x108] sm:$0x1] %v2256_v37  ;;  %v1573_v50 = vld [vmem:[#allocation9 + $0x48] sm:$0xff]  ;;  %v2488_v51 = vld [vmem:[%s3397_s2] ss:$0 sm:$0xff]  ;;  %v1571_v54 = vld [vmem:[#allocation9 + $0x38] sm:$0xff] }
  0x4d   : > { %1585 = vmatpush.msra.mxu1 %v1578_v43  ;;  %1918 = vmatpush.msra.mxu3 %v1578_v43  ;;  %570 = vst [vmem:[#allocation2 + $0x120] sm:$0x1] %v2256_v37  ;;  %v1572_v52 = vld [vmem:[#allocation9 + $0x40] sm:$0xff]  ;;  %v1570_v57 = vld [vmem:[#allocation9 + $0x30] sm:$0xff]  ;;  %v1569_v59 = vld [vmem:[#allocation9 + $0x28] sm:$0xff] }
  0x4e   : > { %383 = vmatpush.msra.mxu0 %v360_v9  ;;  %1910 = vmatpush.msra.mxu2 %v360_v9  ;;  %571 = vst [vmem:[#allocation2 + $0x138] sm:$0x1] %v2256_v37  ;;  %v1568_v61 = vld [vmem:[#allocation9 + $0x20] sm:$0xff]  ;;  %v350_v62 = vld [vmem:[%s2418_s20 + $0xe0] sm:$0xff]  ;;  %v1565_v5 = vld [vmem:[#allocation9 + $0x8] sm:$0xff] }
  0x4f   : > { %1586 = vmatpush.msra.mxu1 %v1577_v44  ;;  %1919 = vmatpush.msra.mxu3 %v1577_v44  ;;  %572 = vst [vmem:[#allocation2 + $0x150] sm:$0x1] %v2256_v37  ;;  %v1567_v63 = vld [vmem:[#allocation9 + $0x18] sm:$0xff]  ;;  %v1566_v2 = vld [vmem:[#allocation9 + $0x10] sm:$0xff]  ;;  %v723_v7 = vld [vmem:[#allocation2 + $0x1] sm:$0xff] }
  0x50   : > { %384 = vmatpush.msra.mxu0 %v359_v10  ;;  %1911 = vmatpush.msra.mxu2 %v359_v10  ;;  %573 = vst [vmem:[#allocation2 + $0x168] sm:$0x1] %v2256_v37  ;;  %v623_v3 = vld [vmem:[#allocation8] sm:$0x7]  ;;  %v1564_v9 = vld [vmem:[#allocation9] sm:$0xff] }
  0x51   : > { %1587 = vmatpush.msra.mxu1 %v1576_v45  ;;  %1920 = vmatpush.msra.mxu3 %v1576_v45  ;;  %574 = vst [vmem:[#allocation2 + $0x180] sm:$0x1] %v2256_v37  ;;  %v2509_v6 = vperm.slane %v623_v3, 0  ;;  %v2513_v10 = vperm.slane %v623_v3, 1 }
  0x52   : > { %385 = vmatpush.msra.mxu0 %v358_v11  ;;  %1912 = vmatpush.msra.mxu2 %v358_v11  ;;  %575 = vst [vmem:[#allocation2 + $0x29] sm:$0x1] %v2256_v37  ;;  %v351_v11 = vld [vmem:[%s2418_s20 + $0xe8] sm:$0xff] }
  0x53   : > { %1588 = vmatpush.msra.mxu1 %v1575_v47  ;;  %1921 = vmatpush.msra.mxu3 %v1575_v47  ;;  %576 = vst [vmem:[#allocation2 + $0x41] sm:$0x1] %v2256_v37 }
  0x54   : > { %386 = vmatpush.msra.mxu0 %v357_v12  ;;  %1913 = vmatpush.msra.mxu2 %v357_v12  ;;  %577 = vst [vmem:[#allocation2 + $0x59] sm:$0x1] %v2256_v37  ;;  %v659_v12 = vmul.f32 0.0, %v2509_v6 }
  0x55   : > { %1589 = vmatpush.msra.mxu1 %v1574_v49  ;;  %1922 = vmatpush.msra.mxu3 %v1574_v49  ;;  %578 = vst [vmem:[#allocation2 + $0x71] sm:$0x1] %v2256_v37 }
  0x56   : > { %387 = vmatpush.msra.mxu0 %v356_v13  ;;  %1914 = vmatpush.msra.mxu2 %v356_v13  ;;  %579 = vst [vmem:[#allocation2 + $0x89] sm:$0x1] %v2256_v37  ;;  %v756_v13 = vmul.f32 %v2513_v10, %v723_v7 }
  0x57   : > { %1590 = vmatpush.msra.mxu1 %v1573_v50  ;;  %1923 = vmatpush.msra.mxu3 %v1573_v50  ;;  %580 = vst [vmem:[#allocation2 + $0xa1] sm:$0x1] %v2256_v37 }
  0x58   : > { %388 = vmatpush.msra.mxu0 %v355_v14  ;;  %1915 = vmatpush.msra.mxu2 %v355_v14  ;;  %581 = vst [vmem:[#allocation2 + $0xb9] sm:$0x1] %v2256_v37  ;;  %v2519_v14 = vperm.slane %v623_v3, 2 }
  0x59   : > { %1591 = vmatpush.msra.mxu1 %v1572_v52  ;;  %1924 = vmatpush.msra.mxu3 %v1572_v52  ;;  %582 = vst [vmem:[#allocation2 + $0xd1] sm:$0x1] %v2256_v37 }
  0x5a   : > { %389 = vmatpush.msra.mxu0 %v354_v15  ;;  %1916 = vmatpush.msra.mxu2 %v354_v15  ;;  %583 = vst [vmem:[#allocation2 + $0xe9] sm:$0x1] %v2256_v37  ;;  %v724_v15 = vld [vmem:[#allocation2 + $0x9] sm:$0xff] }
  0x5b   : > { %390 = vmatmul.f32.vlgmr.msra.gmra.mxu0 %v322_v16  ;;  %438 = vmatmul.f32.vlgmr.msra.gmra.mxu2 %v338_v21  ;;  %584 = vst [vmem:[#allocation2 + $0x101] sm:$0x1] %v2256_v37 }
  0x5c   : > { %1592 = vmatpush.msra.mxu1 %v1571_v54  ;;  %1925 = vmatpush.msra.mxu3 %v1571_v54  ;;  %585 = vst [vmem:[#allocation2 + $0x119] sm:$0x1] %v2256_v37 }
  0x5d   : > { %586 = vst [vmem:[#allocation2 + $0x131] sm:$0x1] %v2256_v37 }
  0x5e   : > { %1593 = vmatpush.msra.mxu1 %v1570_v57  ;;  %1926 = vmatpush.msra.mxu3 %v1570_v57  ;;  %587 = vst [vmem:[#allocation2 + $0x149] sm:$0x1] %v2256_v37 }
  0x5f   : > { %588 = vst [vmem:[#allocation2 + $0x161] sm:$0x1] %v2256_v37 }
  0x60   : > { %1594 = vmatpush.msra.mxu1 %v1569_v59  ;;  %1927 = vmatpush.msra.mxu3 %v1569_v59  ;;  %589 = vst [vmem:[#allocation2 + $0x179] sm:$0x1] %v2256_v37 }
  0x61   : > { %590 = vst [vmem:[#allocation2 + $0x191] sm:$0x1] %v2256_v37 }
  0x62   : > { %1595 = vmatpush.msra.mxu1 %v1568_v61  ;;  %1928 = vmatpush.msra.mxu3 %v1568_v61 }
  0x63   : > { %393 = vmatmul.f32.gmra.mxu0 %v323_v17  ;;  %441 = vmatmul.f32.gmra.mxu2 %v339_v23  ;;  %v820_v17 = vld [vmem:[#allocation2 + $0x2] sm:$0xff] }
  0x64   : > { %1596 = vmatpush.msra.mxu1 %v1567_v63  ;;  %1929 = vmatpush.msra.mxu3 %v1567_v63  ;;  %v853_v23 = vmul.f32 %v2519_v14, %v820_v17 }
  0x66   : > { %1597 = vmatpush.msra.mxu1 %v1566_v2  ;;  %1930 = vmatpush.msra.mxu3 %v1566_v2 }
  0x68   : > { %1598 = vmatpush.msra.mxu1 %v1565_v5  ;;  %1931 = vmatpush.msra.mxu3 %v1565_v5 }
  0x6a   : > { %1599 = vmatpush.msra.mxu1 %v1564_v9  ;;  %1932 = vmatpush.msra.mxu3 %v1564_v9 }
  0x6b   : > { %396 = vmatmul.f32.gmra.mxu0 %v324_v18  ;;  %444 = vmatmul.f32.gmra.mxu2 %v340_v25  ;;  %v821_v25 = vld [vmem:[#allocation2 + $0xa] sm:$0xff] }
  0x73   : > { %399 = vmatmul.f32.gmra.mxu0 %v325_v19  ;;  %447 = vmatmul.f32.gmra.mxu2 %v341_v27  ;;  %v624_v19 = vld [vmem:[#allocation8 + $0x4] sm:$0x7] }
  0x74   : > { %v2535_v37 = vperm.slane %v624_v19, 2 }
  0x7b   : > { %402 = vmatmul.f32.gmra.mxu0 %v326_v20  ;;  %450 = vmatmul.f32.gmra.mxu2 %v342_v29  ;;  %v757_v20 = vmul.f32 %v2513_v10, %v724_v15  ;;  %v854_v29 = vmul.f32 %v2519_v14, %v821_v25 }
  0x83   : > { %405 = vmatmul.f32.gmra.mxu0 %v327_v22  ;;  %453 = vmatmul.f32.gmra.mxu2 %v343_v31  ;;  %v788_v22 = vadd.f32 %v756_v13, %v659_v12 }
  0x8b   : > { %408 = vmatmul.f32.gmra.mxu0 %v328_v24  ;;  %456 = vmatmul.f32.gmra.mxu2 %v344_v33  ;;  %v2524_v24 = vperm.slane %v624_v19, 0 }
  0x93   : > { %411 = vmatmul.f32.gmra.mxu0 %v329_v26  ;;  %459 = vmatmul.f32.gmra.mxu2 %v345_v35 }
  0x9b   : > { %414 = vmatmul.f32.gmra.mxu0 %v330_v28  ;;  %462 = vmatmul.f32.gmra.mxu2 %v346_v38  ;;  %v789_v28 = vadd.f32 %v757_v20, %v659_v12  ;;  %v625_v38 = vld [vmem:[#allocation8 + $0x8] sm:$0x7] }
  0x9c   : > { %v2537_v43 = vperm.slane %v625_v38, 0  ;;  %v2552_v57 = vperm.slane %v625_v38, 1 }
  0xa3   : > { %417 = vmatmul.f32.gmra.mxu0 %v331_v30  ;;  %465 = vmatmul.f32.gmra.mxu2 %v347_v40  ;;  %v885_v30 = vadd.f32 %v853_v23, %v788_v22  ;;  %v886_v40 = vadd.f32 %v854_v29, %v789_v28 }
  0xab   : > { %420 = vmatmul.f32.gmra.mxu0 %v332_v32  ;;  %468 = vmatmul.f32.gmra.mxu2 %v348_v46  ;;  %v352_v32 = vld [vmem:[%s2418_s20 + $0xf0] sm:$0xff] }
  0xb3   : > { %423 = vmatmul.f32.gmra.mxu0 %v333_v34  ;;  %471 = vmatmul.f32.gmra.mxu2 %v349_v53  ;;  %v353_v53 = vld [vmem:[%s2418_s20 + $0xf8] sm:$0xff] }
  0xbb   : > { %426 = vmatmul.f32.gmra.mxu0 %v334_v36  ;;  %474 = vmatmul.f32.gmra.mxu2 %v350_v62  ;;  %v2533_v36 = vperm.slane %v624_v19, 1 }
  0xc3   : > { %429 = vmatmul.f32.gmra.mxu0 %v335_v39  ;;  %477 = vmatmul.f32.gmra.mxu2 %v351_v11 }
  0xcb   : > { %432 = vmatmul.f32.gmra.mxu0 %v336_v42  ;;  %480 = vmatmul.f32.gmra.mxu2 %v352_v32 }
  0xd3   : > { %435 = vmatmul.f32.gmra.mxu0 %v337_v48  ;;  %483 = vmatmul.f32.gmra.mxu2 %v353_v53 }
  0xd8   : > { %v391_v55 = vpop.f32.mrf.mxu0 }
  0xd9   : > { %v392_v56 = vadd.f32 %v2488_v51, %v391_v55 }
  0xdb   : > { %v487_v58 = vmax.f32 %v392_v56, 0.0 }
  0xdd   : > { %v2500_v60 = vmin.f32 %v487_v58, 6.0 }
  0xdf   : > { %591 = vst [vmem:[#allocation2 + $0x19] sm:$0xff] %v2500_v60  ;;  %v1047_v46 = vmul.f32 %v2533_v36, %v2500_v60  ;;  %v758_v2 = vmul.f32 %v2513_v10, %v2500_v60 }
  0xe0   : > { %v394_v0 = vpop.f32.mrf.mxu0 }
  0xe1   : > { %v395_v1 = vadd.f32 %v2488_v51, %v394_v0  ;;  %v2557_v0 = vperm.slane %v625_v38, 2  ;;  %v439_v38 = vpop.f32.mrf.mxu2 }
  0xe2   : > { %v440_v53 = vadd.f32 %v2488_v51, %v439_v38 }
  0xe3   : > { %v488_v4 = vmax.f32 %v395_v1, 0.0 }
  0xe5   : > { %v2511_v8 = vmin.f32 %v488_v4, 6.0 }
  0xe6   : > { %v917_v26 = vld [vmem:[#allocation2 + $0x18] sm:$0xff] }
  0xe7   : > { %592 = vst [vmem:[#allocation2 + $0x21] sm:$0xff] %v2511_v8  ;;  %v950_v31 = vmul.f32 %v2524_v24, %v917_v26  ;;  %v1048_v58 = vmul.f32 %v2533_v36, %v2511_v8  ;;  %v661_v61 = vmul.f32 %v917_v26, %v2509_v6  ;;  %v759_v60 = vmul.f32 %v2513_v10, %v2511_v8 }
  0xe8   : > { %v397_v16 = vpop.f32.mrf.mxu0 }
  0xe9   : > { %v398_v18 = vadd.f32 %v2488_v51, %v397_v16  ;;  %v982_v42 = vadd.f32 %v950_v31, %v885_v30  ;;  %v790_v13 = vadd.f32 %v758_v2, %v661_v61  ;;  %v503_v61 = vmax.f32 %v440_v53, 0.0 }
  0xeb   : > { %v489_v21 = vmax.f32 %v398_v18, 0.0  ;;  %v1079_v49 = vadd.f32 %v1047_v46, %v982_v42 }
  0xed   : > { %v2526_v27 = vmin.f32 %v489_v21, 6.0 }
  0xee   : > { %v918_v34 = vld [vmem:[#allocation2 + $0x20] sm:$0xff] }
  0xef   : > { %593 = vst [vmem:[#allocation2 + $0x31] sm:$0xff] %v2526_v27  ;;  %v1111_v39 = vld [vmem:[#allocation2 + $0x1a] sm:$0xff]  ;;  %v951_v44 = vmul.f32 %v2524_v24, %v918_v34  ;;  %v1112_v59 = vld [vmem:[#allocation2 + $0x22] sm:$0xff]  ;;  %v662_v4 = vmul.f32 %v918_v34, %v2509_v6  ;;  %v1339_v7 = vmul.f32 %v2552_v57, %v2526_v27 }
  0xf0   : > { %v400_v33 = vpop.f32.mrf.mxu0  ;;  %v1144_v47 = vmul.f32 %v2535_v37, %v1111_v39  ;;  %v855_v3 = vmul.f32 %v1111_v39, %v2519_v14  ;;  %v1145_v9 = vmul.f32 %v2535_v37, %v1112_v59  ;;  %v856_v30 = vmul.f32 %v1112_v59, %v2519_v14 }
  0xf1   : > { %v401_v35 = vadd.f32 %v2488_v51, %v400_v33  ;;  %v983_v52 = vadd.f32 %v951_v44, %v886_v40  ;;  %v791_v23 = vadd.f32 %v759_v60, %v662_v4  ;;  %v1049_v39 = vmul.f32 %v2533_v36, %v2526_v27 }
  0xf2   : > { %v1176_v56 = vadd.f32 %v1144_v47, %v1079_v49  ;;  %v887_v22 = vadd.f32 %v855_v3, %v790_v13  ;;  %v2600_v3 = vmin.f32 %v503_v61, 6.0 }
  0xf3   : > { %v490_v41 = vmax.f32 %v401_v35, 0.0  ;;  %v1080_v1 = vadd.f32 %v1048_v58, %v983_v52  ;;  %v888_v40 = vadd.f32 %v856_v30, %v791_v23 }
  0xf4   : > { %607 = vst [vmem:[#allocation2 + $0xd9] sm:$0xff] %v2600_v3 }
  0xf5   : > { %v2540_v45 = vmin.f32 %v490_v41, 6.0  ;;  %v1177_v18 = vadd.f32 %v1145_v9, %v1080_v1 }
  0xf6   : > { %v2545_v48 = vld [vmem:[#allocation2 + $0x30] sm:$0xff] }
  0xf7   : > { %594 = vst [vmem:[#allocation2 + $0x39] sm:$0xff] %v2540_v45  ;;  %v1242_v50 = vmul.f32 %v2537_v43, %v2545_v48  ;;  %v952_v15 = vmul.f32 %v2545_v48, %v2524_v24  ;;  %v1340_v8 = vmul.f32 %v2552_v57, %v2540_v45 }
  0xf8   : > { %v403_v54 = vpop.f32.mrf.mxu0 }
  0xf9   : > { %v404_v55 = vadd.f32 %v2488_v51, %v403_v54  ;;  %v1274_v63 = vadd.f32 %v1242_v50, %v1176_v56  ;;  %v984_v29 = vadd.f32 %v952_v15, %v887_v22 }
  0xfb   : > { %v491_v62 = vmax.f32 %v404_v55, 0.0  ;;  %v1371_v16 = vadd.f32 %v1339_v7, %v1274_v63  ;;  %v1081_v50 = vadd.f32 %v1049_v39, %v984_v29  ;;  %v1050_v55 = vmul.f32 %v2533_v36, %v2540_v45 }
  0xfc   : > { %v663_v63 = vmul.f32 %v2545_v48, %v2509_v6  ;;  %v760_v7 = vmul.f32 %v2513_v10, %v2526_v27 }
  0xfd   : > { %v2563_v5 = vmin.f32 %v491_v62, 6.0 }
  0xfe   : > { %v1403_v11 = vld [vmem:[#allocation2 + $0x32] sm:$0xff]  ;;  %v2575_v21 = vld [vmem:[#allocation2 + $0x3a] sm:$0xff] }
  0xff   : > { %v1210_v12 = vld [vmem:[#allocation2 + $0x38] sm:$0xff]  ;;  %595 = vst [vmem:[#allocation2 + $0x49] sm:$0xff] %v2563_v5  ;;  %v1436_v17 = vmul.f32 %v2557_v0, %v1403_v11  ;;  %v1437_v35 = vmul.f32 %v2557_v0, %v2575_v21  ;;  %v1146_v46 = vmul.f32 %v1403_v11, %v2535_v37  ;;  %v1147_v4 = vmul.f32 %v2575_v21, %v2535_v37 }
 0x100   : > { %v1243_v19 = vmul.f32 %v2537_v43, %v1210_v12  ;;  %v406_v20 = vpop.f32.mrf.mxu0  ;;  %v953_v31 = vmul.f32 %v1210_v12, %v2524_v24  ;;  %v857_v9 = vmul.f32 %v1403_v11, %v2519_v14  ;;  %v664_v13 = vmul.f32 %v1210_v12, %v2509_v6 }
 0x101   : > { %v407_v25 = vadd.f32 %v2488_v51, %v406_v20  ;;  %v1468_v26 = vadd.f32 %v1436_v17, %v1371_v16  ;;  %v1178_v59 = vadd.f32 %v1146_v46, %v1081_v50  ;;  %v1341_v48 = vmul.f32 %v2552_v57, %v2563_v5  ;;  %v442_v16 = vpop.f32.mrf.mxu2 }
 0x102   : > { %v1275_v28 = vadd.f32 %v1243_v19, %v1177_v18  ;;  %v985_v49 = vadd.f32 %v953_v31, %v888_v40  ;;  %v792_v20 = vadd.f32 %v760_v7, %v663_v63  ;;  %v761_v11 = vmul.f32 %v2513_v10, %v2540_v45 }
 0x103   : > { %v492_v32 = vmax.f32 %v407_v25, 0.0  ;;  %v1500_v33 = vmax.f32 %v1468_v26, 0.0  ;;  %v1051_v46 = vmul.f32 %v2533_v36, %v2563_v5 }
 0x104   : > { %v1372_v34 = vadd.f32 %v1340_v8, %v1275_v28  ;;  %v1082_v62 = vadd.f32 %v1050_v55, %v985_v49  ;;  %v889_v28 = vadd.f32 %v857_v9, %v792_v20  ;;  %v443_v8 = vadd.f32 %v2488_v51, %v442_v16 }
 0x105   : > { %v2586_v41 = vmin.f32 %v492_v32, 6.0  ;;  %v1532_v42 = vmin.f32 %v1500_v33, 6.0  ;;  %v793_v29 = vadd.f32 %v761_v11, %v664_v13 }
 0x106   : > { %v1469_v44 = vadd.f32 %v1437_v35, %v1372_v34  ;;  %v2589_v47 = vld [vmem:[#allocation2 + $0x48] sm:$0xff]  ;;  %v1179_v18 = vadd.f32 %v1147_v4, %v1082_v62  ;;  %v504_v34 = vmax.f32 %v443_v8, 0.0  ;;  %v858_v35 = vmul.f32 %v2575_v21, %v2519_v14 }
 0x107   : > { %596 = vst [vmem:[#allocation2 + $0x51] sm:$0xff] %v2586_v41  ;;  %1600 = vmatmul.f32.vlgmr.msra.gmra.mxu1 %v1532_v42  ;;  %v1244_v52 = vmul.f32 %v2537_v43, %v2589_v47  ;;  %v954_v27 = vmul.f32 %v2589_v47, %v2524_v24  ;;  %v1342_v45 = vmul.f32 %v2552_v57, %v2586_v41 }
 0x108   : > { %v409_v54 = vpop.f32.mrf.mxu0  ;;  %v1501_v58 = vmax.f32 %v1469_v44, 0.0  ;;  %v2633_v49 = vmin.f32 %v504_v34, 6.0  ;;  %v890_v50 = vadd.f32 %v858_v35, %v793_v29 }
 0x109   : > { %v410_v56 = vadd.f32 %v2488_v51, %v409_v54  ;;  %v1276_v2 = vadd.f32 %v1244_v52, %v1178_v59  ;;  %v986_v33 = vadd.f32 %v954_v27, %v889_v28  ;;  %v762_v27 = vmul.f32 %v2513_v10, %v2563_v5 }
 0x10a   : > { %v1533_v60 = vmin.f32 %v1501_v58, 6.0  ;;  %608 = vst [vmem:[#allocation2 + $0xe1] sm:$0xff] %v2633_v49  ;;  %v445_v58 = vpop.f32.mrf.mxu2  ;;  %v763_v5 = vmul.f32 %v2513_v10, %v2586_v41 }
 0x10b   : > { %v493_v1 = vmax.f32 %v410_v56, 0.0  ;;  %v1373_v12 = vadd.f32 %v1341_v48, %v1276_v2  ;;  %v1083_v59 = vadd.f32 %v1051_v46, %v986_v33  ;;  %v446_v62 = vadd.f32 %v2488_v51, %v445_v58 }
 0x10d   : > { %v2608_v15 = vmin.f32 %v493_v1, 6.0  ;;  %v1052_v1 = vmul.f32 %v2533_v36, %v2586_v41  ;;  %v505_v9 = vmax.f32 %v446_v62, 0.0 }
 0x10e   : > { %v1405_v17 = vld [vmem:[#allocation2 + $0x4a] sm:$0xff]  ;;  %v2620_v26 = vld [vmem:[#allocation2 + $0x52] sm:$0xff] }
 0x10f   : > { %v1212_v19 = vld [vmem:[#allocation2 + $0x50] sm:$0xff]  ;;  %597 = vst [vmem:[#allocation2 + $0x61] sm:$0xff] %v2608_v15  ;;  %1603 = vmatmul.f32.gmra.mxu1 %v1533_v60  ;;  %v1438_v22 = vmul.f32 %v2557_v0, %v1405_v17  ;;  %v1439_v44 = vmul.f32 %v2557_v0, %v2620_v26  ;;  %v1148_v21 = vmul.f32 %v1405_v17, %v2535_v37 }
 0x110   : > { %v1245_v23 = vmul.f32 %v2537_v43, %v1212_v19  ;;  %v412_v25 = vpop.f32.mrf.mxu0  ;;  %v955_v38 = vmul.f32 %v1212_v19, %v2524_v24  ;;  %v665_v60 = vmul.f32 %v2589_v47, %v2509_v6  ;;  %v1149_v20 = vmul.f32 %v2620_v26, %v2535_v37 }
 0x111   : > { %v413_v30 = vadd.f32 %v2488_v51, %v412_v25  ;;  %v1470_v31 = vadd.f32 %v1438_v22, %v1373_v12  ;;  %v1180_v7 = vadd.f32 %v1148_v21, %v1083_v59  ;;  %v859_v11 = vmul.f32 %v1405_v17, %v2519_v14 }
 0x112   : > { %v1277_v32 = vadd.f32 %v1245_v23, %v1179_v18  ;;  %v987_v56 = vadd.f32 %v955_v38, %v890_v50  ;;  %v2650_v18 = vmin.f32 %v505_v9, 6.0  ;;  %v666_v12 = vmul.f32 %v1212_v19, %v2509_v6 }
 0x113   : > { %v494_v39 = vmax.f32 %v413_v30, 0.0  ;;  %v1502_v40 = vmax.f32 %v1470_v31, 0.0  ;;  %v1343_v47 = vmul.f32 %v2552_v57, %v2608_v15  ;;  %v794_v29 = vadd.f32 %v762_v27, %v665_v60 }
 0x114   : > { %v1374_v42 = vadd.f32 %v1342_v45, %v1277_v32  ;;  %v1084_v13 = vadd.f32 %v1052_v1, %v987_v56  ;;  %609 = vst [vmem:[#allocation2 + $0xf1] sm:$0xff] %v2650_v18  ;;  %v448_v32 = vpop.f32.mrf.mxu2  ;;  %v795_v38 = vadd.f32 %v763_v5, %v666_v12  ;;  %v860_v50 = vmul.f32 %v2620_v26, %v2519_v14 }
 0x115   : > { %v2635_v52 = vmin.f32 %v494_v39, 6.0  ;;  %v1534_v53 = vmin.f32 %v1502_v40, 6.0  ;;  %v891_v34 = vadd.f32 %v859_v11, %v794_v29  ;;  %v449_v35 = vadd.f32 %v2488_v51, %v448_v32 }
 0x116   : > { %v1471_v54 = vadd.f32 %v1439_v44, %v1374_v42  ;;  %v2638_v55 = vld [vmem:[#allocation2 + $0x60] sm:$0xff]  ;;  %v1181_v28 = vadd.f32 %v1149_v20, %v1084_v13  ;;  %v1053_v59 = vmul.f32 %v2533_v36, %v2608_v15  ;;  %v892_v62 = vadd.f32 %v860_v50, %v795_v38 }
 0x117   : > { %598 = vst [vmem:[#allocation2 + $0x69] sm:$0xff] %v2635_v52  ;;  %1606 = vmatmul.f32.gmra.mxu1 %v1534_v53  ;;  %v1246_v61 = vmul.f32 %v2537_v43, %v2638_v55  ;;  %v956_v30 = vmul.f32 %v2638_v55, %v2524_v24  ;;  %v1344_v41 = vmul.f32 %v2552_v57, %v2635_v52  ;;  %v506_v46 = vmax.f32 %v449_v35, 0.0 }
 0x118   : > { %v415_v63 = vpop.f32.mrf.mxu0  ;;  %v1503_v4 = vmax.f32 %v1471_v54, 0.0  ;;  %v667_v9 = vmul.f32 %v2638_v55, %v2509_v6  ;;  %v1054_v20 = vmul.f32 %v2533_v36, %v2635_v52  ;;  %v764_v11 = vmul.f32 %v2513_v10, %v2608_v15 }
 0x119   : > { %v416_v2 = vadd.f32 %v2488_v51, %v415_v63  ;;  %v1278_v16 = vadd.f32 %v1246_v61, %v1180_v7  ;;  %v988_v44 = vadd.f32 %v956_v30, %v891_v34  ;;  %v2680_v61 = vmin.f32 %v506_v46, 6.0 }
 0x11a   : > { %v1535_v23 = vmin.f32 %v1503_v4, 6.0  ;;  %v796_v5 = vadd.f32 %v764_v11, %v667_v9 }
 0x11b   : > { %v495_v48 = vmax.f32 %v416_v2, 0.0  ;;  %v1375_v17 = vadd.f32 %v1343_v47, %v1278_v16  ;;  %610 = vst [vmem:[#allocation2 + $0xf9] sm:$0xff] %v2680_v61  ;;  %v1085_v13 = vadd.f32 %v1053_v59, %v988_v44 }
 0x11d   : > { %v2658_v22 = vmin.f32 %v495_v48, 6.0  ;;  %v451_v48 = vpop.f32.mrf.mxu2 }
 0x11e   : > { %v1407_v25 = vld [vmem:[#allocation2 + $0x62] sm:$0xff]  ;;  %v1408_v33 = vld [vmem:[#allocation2 + $0x6a] sm:$0xff]  ;;  %v452_v27 = vadd.f32 %v2488_v51, %v451_v48 }
 0x11f   : > { %v1214_v8 = vld [vmem:[#allocation2 + $0x68] sm:$0xff]  ;;  %599 = vst [vmem:[#allocation2 + $0x79] sm:$0xff] %v2658_v22  ;;  %1609 = vmatmul.f32.gmra.mxu1 %v1535_v23  ;;  %v1440_v19 = vmul.f32 %v2557_v0, %v1407_v25  ;;  %v1441_v58 = vmul.f32 %v2557_v0, %v1408_v33  ;;  %v1150_v4 = vmul.f32 %v1407_v25, %v2535_v37 }
 0x120   : > { %v1247_v31 = vmul.f32 %v2537_v43, %v1214_v8  ;;  %v418_v45 = vpop.f32.mrf.mxu0  ;;  %v957_v53 = vmul.f32 %v1214_v8, %v2524_v24  ;;  %v668_v12 = vmul.f32 %v1214_v8, %v2509_v6  ;;  %v507_v30 = vmax.f32 %v452_v27, 0.0 }
 0x121   : > { %v419_v39 = vadd.f32 %v2488_v51, %v418_v45  ;;  %v1472_v40 = vadd.f32 %v1440_v19, %v1375_v17  ;;  %v1182_v47 = vadd.f32 %v1150_v4, %v1085_v13  ;;  %v765_v17 = vmul.f32 %v2513_v10, %v2635_v52 }
 0x122   : > { %v1279_v42 = vadd.f32 %v1247_v31, %v1181_v28  ;;  %v989_v7 = vadd.f32 %v957_v53, %v892_v62  ;;  %v861_v28 = vmul.f32 %v1407_v25, %v2519_v14  ;;  %v1345_v32 = vmul.f32 %v2552_v57, %v2658_v22 }
 0x123   : > { %v496_v54 = vmax.f32 %v419_v39, 0.0  ;;  %v1504_v21 = vmax.f32 %v1472_v40, 0.0  ;;  %v1151_v15 = vmul.f32 %v1408_v33, %v2535_v37  ;;  %v2703_v8 = vmin.f32 %v507_v30, 6.0 }
 0x124   : > { %v1376_v56 = vadd.f32 %v1344_v41, %v1279_v42  ;;  %v1086_v29 = vadd.f32 %v1054_v20, %v989_v7  ;;  %v1055_v25 = vmul.f32 %v2533_v36, %v2658_v22  ;;  %v797_v34 = vadd.f32 %v765_v17, %v668_v12 }
 0x125   : > { %v2682_v63 = vmin.f32 %v496_v54, 6.0  ;;  %v1536_v1 = vmin.f32 %v1504_v21, 6.0  ;;  %3428 = vst [vmem:[#allocation16_spill] sm:$0xff] %v2703_v8  ;;  %v893_v39 = vadd.f32 %v861_v28, %v796_v5  ;;  %v862_v52 = vmul.f32 %v1408_v33, %v2519_v14  ;;  %v454_v21 = vpop.f32.mrf.mxu2 }
 0x126   : > { %v1473_v2 = vadd.f32 %v1441_v58, %v1376_v56  ;;  %v1215_v26 = vld [vmem:[#allocation2 + $0x78] sm:$0xff]  ;;  %v1183_v42 = vadd.f32 %v1151_v15, %v1086_v29  ;;  %611 = vst [vmem:[#allocation2 + $0x109] sm:$0xff] %v2703_v8  ;;  %v766_v50 = vmul.f32 %v2513_v10, %v2658_v22  ;;  %v455_v62 = vadd.f32 %v2488_v51, %v454_v21 }
 0x127   : > { %600 = vst [vmem:[#allocation2 + $0x81] sm:$0xff] %v2682_v63  ;;  %1612 = vmatmul.f32.gmra.mxu1 %v1536_v1  ;;  %v1248_v60 = vmul.f32 %v2537_v43, %v1215_v26  ;;  %v958_v45 = vmul.f32 %v1215_v26, %v2524_v24  ;;  %v1346_v44 = vmul.f32 %v2552_v57, %v2682_v63 }
 0x128   : > { %v421_v16 = vpop.f32.mrf.mxu0  ;;  %v1505_v23 = vmax.f32 %v1473_v2, 0.0  ;;  %v669_v46 = vmul.f32 %v1215_v26, %v2509_v6  ;;  %v894_v1 = vadd.f32 %v862_v52, %v797_v34  ;;  %v1056_v7 = vmul.f32 %v2533_v36, %v2682_v63 }
 0x129   : > { %v422_v55 = vadd.f32 %v2488_v51, %v421_v16  ;;  %v1280_v31 = vadd.f32 %v1248_v60, %v1182_v47  ;;  %v990_v59 = vadd.f32 %v958_v45, %v893_v39  ;;  %v508_v13 = vmax.f32 %v455_v62, 0.0 }
 0x12a   : > { %v1537_v38 = vmin.f32 %v1505_v23, 6.0  ;;  %v798_v48 = vadd.f32 %v766_v50, %v669_v46  ;;  %v767_v5 = vmul.f32 %v2513_v10, %v2682_v63 }
 0x12b   : > { %v497_v19 = vmax.f32 %v422_v55, 0.0  ;;  %v1377_v53 = vadd.f32 %v1345_v32, %v1280_v31  ;;  %v1087_v12 = vadd.f32 %v1055_v25, %v990_v59  ;;  %v2727_v55 = vmin.f32 %v508_v13, 6.0 }
 0x12d   : > { %v2708_v35 = vmin.f32 %v497_v19, 6.0  ;;  %612 = vst [vmem:[#allocation2 + $0x111] sm:$0xff] %v2727_v55  ;;  %v457_v25 = vpop.f32.mrf.mxu2 }
 0x12e   : > { %v1409_v40 = vld [vmem:[#allocation2 + $0x7a] sm:$0xff]  ;;  %v1410_v58 = vld [vmem:[#allocation2 + $0x82] sm:$0xff]  ;;  %v458_v52 = vadd.f32 %v2488_v51, %v457_v25 }
 0x12f   : > { %v1216_v41 = vld [vmem:[#allocation2 + $0x80] sm:$0xff]  ;;  %601 = vst [vmem:[#allocation2 + $0x91] sm:$0xff] %v2708_v35  ;;  %1615 = vmatmul.f32.gmra.mxu1 %v1537_v38  ;;  %v1442_v54 = vmul.f32 %v2557_v0, %v1409_v40  ;;  %v1152_v9 = vmul.f32 %v1409_v40, %v2535_v37  ;;  %v1443_v11 = vmul.f32 %v2557_v0, %v1410_v58 }
 0x130   : > { %v1249_v33 = vmul.f32 %v2537_v43, %v1216_v41  ;;  %v424_v56 = vpop.f32.mrf.mxu0  ;;  %v959_v2 = vmul.f32 %v1216_v41, %v2524_v24  ;;  %v863_v23 = vmul.f32 %v1409_v40, %v2519_v14  ;;  %v670_v47 = vmul.f32 %v1216_v41, %v2509_v6 }
 0x131   : > { %v425_v4 = vadd.f32 %v2488_v51, %v424_v56  ;;  %v1474_v22 = vadd.f32 %v1442_v54, %v1377_v53  ;;  %v1184_v17 = vadd.f32 %v1152_v9, %v1087_v12  ;;  %v1347_v31 = vmul.f32 %v2552_v57, %v2708_v35 }
 0x132   : > { %v1281_v26 = vadd.f32 %v1249_v33, %v1183_v42  ;;  %v991_v60 = vadd.f32 %v959_v2, %v894_v1  ;;  %v1153_v15 = vmul.f32 %v1410_v58, %v2535_v37  ;;  %v799_v38 = vadd.f32 %v767_v5, %v670_v47 }
 0x133   : > { %v498_v16 = vmax.f32 %v425_v4, 0.0  ;;  %v1506_v20 = vmax.f32 %v1474_v22, 0.0  ;;  %v895_v40 = vadd.f32 %v863_v23, %v798_v48  ;;  %v1057_v46 = vmul.f32 %v2533_v36, %v2708_v35  ;;  %v2761_v48 = vld [vmem:[#allocation2 + $0xe0] sm:$0xff] }
 0x134   : > { %v1378_v27 = vadd.f32 %v1346_v44, %v1281_v26  ;;  %v1088_v32 = vadd.f32 %v1056_v7, %v991_v60  ;;  %v864_v50 = vmul.f32 %v1410_v58, %v2519_v14  ;;  %v509_v54 = vmax.f32 %v458_v52, 0.0  ;;  %v933_v26 = vld [vmem:[#allocation2 + $0xd8] sm:$0xff] }
 0x135   : > { %v530_v28 = vmin.f32 %v498_v16, 6.0  ;;  %v1538_v29 = vmin.f32 %v1506_v20, 6.0  ;;  %v768_v21 = vmul.f32 %v2513_v10, %v2708_v35  ;;  %v2750_v1 = vmul.f32 %v2533_v36, %v2600_v3  ;;  %v1127_v60 = vld [vmem:[#allocation2 + $0xda] sm:$0xff] }
 0x136   : > { %v1475_v30 = vadd.f32 %v1443_v11, %v1378_v27  ;;  %v1217_v19 = vld [vmem:[#allocation2 + $0x90] sm:$0xff]  ;;  %v1185_v53 = vadd.f32 %v1153_v15, %v1088_v32  ;;  %v896_v62 = vadd.f32 %v864_v50, %v799_v38  ;;  %v2752_v4 = vmin.f32 %v509_v54, 6.0 }
 0x137   : > { %602 = vst [vmem:[#allocation2 + $0x99] sm:$0xff] %v530_v28  ;;  %1618 = vmatmul.f32.gmra.mxu1 %v1538_v29  ;;  %v1250_v45 = vmul.f32 %v2537_v43, %v1217_v19  ;;  %v960_v34 = vmul.f32 %v1217_v19, %v2524_v24  ;;  %v671_v42 = vmul.f32 %v1217_v19, %v2509_v6 }
 0x138   : > { %v427_v39 = vpop.f32.mrf.mxu0  ;;  %v1507_v63 = vmax.f32 %v1475_v30, 0.0  ;;  %v1348_v59 = vmul.f32 %v2552_v57, %v530_v28  ;;  %3429 = vst [vmem:[#allocation17_spill] sm:$0xff] %v2752_v4  ;;  %v1058_v22 = vmul.f32 %v2533_v36, %v530_v28  ;;  %v769_v35 = vmul.f32 %v2513_v10, %v530_v28  ;;  %v460_v30 = vpop.f32.mrf.mxu2 }
 0x139   : > { %v428_v41 = vadd.f32 %v2488_v51, %v427_v39  ;;  %v1282_v44 = vadd.f32 %v1250_v45, %v1184_v17  ;;  %v992_v33 = vadd.f32 %v960_v34, %v895_v40  ;;  %v800_v58 = vadd.f32 %v768_v21, %v671_v42  ;;  %613 = vst [vmem:[#allocation2 + $0x121] sm:$0xff] %v2752_v4  ;;  %v2876_v4 = vld [vmem:[#allocation2 + $0x108] sm:$0xff] }
 0x13a   : > { %v1539_v2 = vmin.f32 %v1507_v63, 6.0  ;;  %v2759_v13 = vmul.f32 %v2524_v24, %v933_v26  ;;  %v2765_v11 = vmul.f32 %v2535_v37, %v1127_v60  ;;  %v2768_v12 = vmul.f32 %v2537_v43, %v933_v26  ;;  %3440 = vst [vmem:[#allocation28_spill] sm:$0xff] %v2876_v4 }
 0x13b   : > { %v499_v56 = vmax.f32 %v428_v41, 0.0  ;;  %v1379_v9 = vadd.f32 %v1347_v31, %v1282_v44  ;;  %v1089_v27 = vadd.f32 %v1057_v46, %v992_v33  ;;  %v2772_v23 = vmul.f32 %v2552_v57, %v2600_v3 }
 0x13c   : > { %v2778_v5 = vmul.f32 %v2557_v0, %v1127_v60  ;;  %v461_v19 = vadd.f32 %v2488_v51, %v460_v30  ;;  %v2784_v32 = vmul.f32 %v2524_v24, %v2761_v48  ;;  %v2788_v15 = vmul.f32 %v2533_v36, %v2633_v49 }
 0x13d   : > { %v2755_v7 = vmin.f32 %v499_v56, 6.0  ;;  %v2793_v38 = vmul.f32 %v2537_v43, %v2761_v48  ;;  %v2798_v40 = vmul.f32 %v2552_v57, %v2633_v49  ;;  %v2806_v33 = vmul.f32 %v933_v26, %v2509_v6 }
 0x13e   : > { %v1411_v16 = vld [vmem:[#allocation2 + $0x92] sm:$0xff]  ;;  %v1412_v29 = vld [vmem:[#allocation2 + $0x9a] sm:$0xff]  ;;  %3430 = vst [vmem:[#allocation18_spill] sm:$0xff] %v2778_v5  ;;  %v510_v63 = vmax.f32 %v461_v19, 0.0 }
 0x13f   : > { %v1218_v20 = vld [vmem:[#allocation2 + $0x98] sm:$0xff]  ;;  %603 = vst [vmem:[#allocation2 + $0xa9] sm:$0xff] %v2755_v7  ;;  %1621 = vmatmul.f32.gmra.mxu1 %v1539_v2  ;;  %v1444_v47 = vmul.f32 %v2557_v0, %v1411_v16  ;;  %v1445_v39 = vmul.f32 %v2557_v0, %v1412_v29  ;;  %v1154_v46 = vmul.f32 %v1411_v16, %v2535_v37 }
 0x140   : > { %v1251_v28 = vmul.f32 %v2537_v43, %v1218_v20  ;;  %v430_v17 = vpop.f32.mrf.mxu0  ;;  %v961_v31 = vmul.f32 %v1218_v20, %v2524_v24  ;;  %3431 = vst [vmem:[#allocation19_spill] sm:$0xff] %v2793_v38  ;;  %v2801_v50 = vmin.f32 %v510_v63, 6.0  ;;  %v672_v54 = vmul.f32 %v1218_v20, %v2509_v6  ;;  %v463_v30 = vpop.f32.mrf.mxu2 }
 0x141   : > { %v431_v45 = vadd.f32 %v2488_v51, %v430_v17  ;;  %v1476_v25 = vadd.f32 %v1444_v47, %v1379_v9  ;;  %3432 = vst [vmem:[#allocation20_spill] sm:$0xff] %v2798_v40  ;;  %v774_v2 = vmul.f32 %v2513_v10, %v2600_v3  ;;  %v2815_v20 = vmul.f32 %v1127_v60, %v2519_v14 }
 0x142   : > { %v1283_v34 = vadd.f32 %v1251_v28, %v1185_v53  ;;  %v993_v52 = vadd.f32 %v961_v31, %v896_v62  ;;  %3433 = vst [vmem:[#allocation21_spill] sm:$0xff] %v2801_v50  ;;  %v865_v53 = vmul.f32 %v1411_v16, %v2519_v14  ;;  %v1155_v16 = vmul.f32 %v1412_v29, %v2535_v37 }
 0x143   : > { %v500_v42 = vmax.f32 %v431_v45, 0.0  ;;  %v1508_v41 = vmax.f32 %v1476_v25, 0.0  ;;  %614 = vst [vmem:[#allocation2 + $0x129] sm:$0xff] %v2801_v50  ;;  %v1186_v26 = vadd.f32 %v1154_v46, %v1089_v27  ;;  %v464_v31 = vadd.f32 %v2488_v51, %v463_v30 }
 0x144   : > { %v1380_v44 = vadd.f32 %v1348_v59, %v1283_v34  ;;  %v1349_v59 = vmul.f32 %v2552_v57, %v2755_v7  ;;  %v1090_v47 = vadd.f32 %v1058_v22, %v993_v52  ;;  %v897_v45 = vadd.f32 %v865_v53, %v800_v58 }
 0x145   : > { %v532_v21 = vmin.f32 %v500_v42, 6.0  ;;  %v1540_v56 = vmin.f32 %v1508_v41, 6.0  ;;  %v801_v25 = vadd.f32 %v769_v35, %v672_v54  ;;  %v1059_v60 = vmul.f32 %v2533_v36, %v2755_v7 }
 0x146   : > { %v1477_v62 = vadd.f32 %v1445_v39, %v1380_v44  ;;  %v1219_v9 = vld [vmem:[#allocation2 + $0xa8] sm:$0xff]  ;;  %v866_v34 = vmul.f32 %v1412_v29, %v2519_v14  ;;  %v1187_v63 = vadd.f32 %v1155_v16, %v1090_v47  ;;  %v511_v52 = vmax.f32 %v464_v31, 0.0 }
 0x147   : > { %604 = vst [vmem:[#allocation2 + $0xb1] sm:$0xff] %v532_v21  ;;  %1624 = vmatmul.f32.gmra.mxu1 %v1540_v56  ;;  %v1252_v28 = vmul.f32 %v2537_v43, %v1219_v9  ;;  %v962_v3 = vmul.f32 %v1219_v9, %v2524_v24  ;;  %v673_v27 = vmul.f32 %v1219_v9, %v2509_v6  ;;  %v2835_v56 = vld [vmem:[#allocation2 + $0xf0] sm:$0xff] }
 0x148   : > { %v433_v17 = vpop.f32.mrf.mxu0  ;;  %v1509_v19 = vmax.f32 %v1477_v62, 0.0  ;;  %v1350_v44 = vmul.f32 %v2552_v57, %v532_v21  ;;  %v2828_v58 = vmul.f32 %v2552_v57, %v2650_v18  ;;  %v770_v35 = vmul.f32 %v2513_v10, %v2755_v7  ;;  %v2837_v62 = vld [vmem:[#allocation2 + $0xf2] sm:$0xff] }
 0x149   : > { %v434_v22 = vadd.f32 %v2488_v51, %v433_v17  ;;  %v1284_v39 = vadd.f32 %v1252_v28, %v1186_v26  ;;  %v994_v42 = vadd.f32 %v962_v3, %v897_v45  ;;  %v2832_v53 = vmin.f32 %v511_v52, 6.0  ;;  %3435 = vst [vmem:[#allocation23_spill] sm:$0xff] %v2837_v62  ;;  %v2849_v26 = vld [vmem:[#allocation2 + $0xe2] sm:$0xff]  ;;  %v2851_v28 = vld [vmem:[#allocation2 + $0xf8] sm:$0xff] }
 0x14a   : > { %v1541_v46 = vmin.f32 %v1509_v19, 6.0  ;;  %v898_v29 = vadd.f32 %v866_v34, %v801_v25  ;;  %v1060_v54 = vmul.f32 %v2533_v36, %v532_v21  ;;  %v2843_v47 = vmul.f32 %v2537_v43, %v2835_v56  ;;  %3437 = vst [vmem:[#allocation25_spill] sm:$0xff] %v2849_v26  ;;  %v466_v34 = vpop.f32.mrf.mxu2 }
 0x14b   : > { %v501_v41 = vmax.f32 %v434_v22, 0.0  ;;  %3434 = vst [vmem:[#allocation22_spill] sm:$0xff] %v2832_v53  ;;  %v2847_v16 = vmul.f32 %v2557_v0, %v2837_v62  ;;  %v802_v7 = vadd.f32 %v770_v35, %v673_v27  ;;  %v1381_v30 = vadd.f32 %v1349_v59, %v1284_v39 }
 0x14c   : > { %615 = vst [vmem:[#allocation2 + $0x139] sm:$0xff] %v2832_v53  ;;  %v1091_v19 = vadd.f32 %v1059_v60, %v994_v42  ;;  %v2856_v31 = vmul.f32 %v2535_v37, %v2849_v26  ;;  %v2860_v45 = vmul.f32 %v2537_v43, %v2851_v28  ;;  %v2867_v60 = vmul.f32 %v2552_v57, %v2680_v61 }
 0x14d   : > { %v2839_v9 = vmin.f32 %v501_v41, 6.0  ;;  %3436 = vst [vmem:[#allocation24_spill] sm:$0xff] %v2847_v16  ;;  %v467_v39 = vadd.f32 %v2488_v51, %v466_v34  ;;  %v771_v42 = vmul.f32 %v2513_v10, %v532_v21  ;;  %v806_v41 = vadd.f32 %v774_v2, %v2806_v33 }
 0x14e   : > { %v1413_v3 = vld [vmem:[#allocation2 + $0xaa] sm:$0xff]  ;;  %3438 = vst [vmem:[#allocation26_spill] sm:$0xff] %v2860_v45  ;;  %v1414_v22 = vld [vmem:[#allocation2 + $0xb2] sm:$0xff]  ;;  %v968_v50 = vmul.f32 %v2835_v56, %v2524_v24  ;;  %v1065_v34 = vmul.f32 %v2533_v36, %v2650_v18  ;;  %v2883_v21 = vmul.f32 %v2837_v62, %v2535_v37  ;;  %v2895_v62 = vmul.f32 %v2552_v57, %v2703_v8 }
 0x14f   : > { %v1220_v17 = vld [vmem:[#allocation2 + $0xb0] sm:$0xff]  ;;  %605 = vst [vmem:[#allocation2 + $0xc1] sm:$0xff] %v2839_v9  ;;  %1627 = vmatmul.f32.gmra.mxu1 %v1541_v46  ;;  %v1446_v25 = vmul.f32 %v2557_v0, %v1413_v3  ;;  %v1447_v40 = vmul.f32 %v2557_v0, %v1414_v22 }
 0x150   : > { %v1253_v59 = vmul.f32 %v2537_v43, %v1220_v17  ;;  %3439 = vst [vmem:[#allocation27_spill] sm:$0xff] %v2867_v60  ;;  %v436_v27 = vpop.f32.mrf.mxu0  ;;  %v963_v52 = vmul.f32 %v1220_v17, %v2524_v24  ;;  %v512_v60 = vmax.f32 %v467_v39, 0.0 }
 0x151   : > { %v437_v35 = vadd.f32 %v2488_v51, %v436_v27  ;;  %v1478_v46 = vadd.f32 %v1446_v25, %v1381_v30  ;;  %v2891_v27 = vmul.f32 %v2537_v43, %v2876_v4  ;;  %3442 = vst [vmem:[#allocation30_spill] sm:$0xff] %v2895_v62 }
 0x152   : > { %v1285_v53 = vadd.f32 %v1253_v59, %v1187_v63  ;;  %v1156_v63 = vmul.f32 %v1413_v3, %v2535_v37  ;;  %v2886_v30 = vmin.f32 %v512_v60, 6.0  ;;  %v995_v25 = vadd.f32 %v963_v52, %v898_v29 }
 0x153   : > { %v502_v33 = vmax.f32 %v437_v35, 0.0  ;;  %v1510_v2 = vmax.f32 %v1478_v46, 0.0  ;;  %v867_v59 = vmul.f32 %v1413_v3, %v2519_v14  ;;  %v674_v29 = vmul.f32 %v1220_v17, %v2509_v6  ;;  %v469_v46 = vpop.f32.mrf.mxu2 }
 0x154   : > { %v1382_v51 = vadd.f32 %v1350_v44, %v1285_v53  ;;  %3441 = vst [vmem:[#allocation29_spill] sm:$0xff] %v2886_v30  ;;  %v1351_v44 = vmul.f32 %v2552_v57, %v2839_v9  ;;  %v1157_v53 = vmul.f32 %v1414_v22, %v2535_v37  ;;  %v903_v3 = vadd.f32 %v2815_v20, %v806_v41 }
 0x155   : > { %v534_v39 = vmin.f32 %v502_v33, 6.0  ;;  %v1542_v16 = vmin.f32 %v1510_v2, 6.0  ;;  %616 = vst [vmem:[#allocation2 + $0x141] sm:$0xff] %v2886_v30  ;;  %v1188_v60 = vadd.f32 %v1156_v63, %v1091_v19  ;;  %v772_v52 = vmul.f32 %v2513_v10, %v2839_v9  ;;  %v2909_v2 = vld [vmem:[%s3397_s2] ss:$0 sm:$0xff] }
 0x156   : > { %v1479_v38 = vadd.f32 %v1447_v40, %v1382_v51  ;;  %v1221_v35 = vld [vmem:[#allocation2 + $0xc0] sm:$0xff]  ;;  %v1092_v33 = vadd.f32 %v1060_v54, %v995_v25  ;;  %v470_v51 = vadd.f32 %v2909_v2, %v469_v46  ;;  %v899_v17 = vadd.f32 %v867_v59, %v802_v7 }
 0x157   : > { %606 = vst [vmem:[#allocation2 + $0xc9] sm:$0xff] %v534_v39  ;;  %1630 = vmatmul.f32.gmra.mxu1 %v1542_v16  ;;  %v1254_v40 = vmul.f32 %v2537_v43, %v1221_v35  ;;  %v964_v20 = vmul.f32 %v1221_v35, %v2524_v24  ;;  %v675_v16 = vmul.f32 %v1221_v35, %v2509_v6  ;;  %v2916_v25 = vld [vmem:[#allocation2 + $0xfa] sm:$0xff] }
 0x158   : > { %v1511_v41 = vmax.f32 %v1479_v38, 0.0  ;;  %v1061_v19 = vmul.f32 %v2533_v36, %v2839_v9  ;;  %v803_v63 = vadd.f32 %v771_v42, %v674_v29  ;;  %v513_v8 = vmax.f32 %v470_v51, 0.0 }
 0x159   : > { %v1286_v30 = vadd.f32 %v1254_v40, %v1188_v60  ;;  %v996_v54 = vadd.f32 %v964_v20, %v899_v17  ;;  %v1000_v4 = vadd.f32 %v968_v50, %v903_v3  ;;  %v2920_v62 = vmul.f32 %v2557_v0, %v2916_v25 }
 0x15a   : > { %v868_v7 = vmul.f32 %v1414_v22, %v2519_v14  ;;  %v678_v38 = vmul.f32 %v2761_v48, %v2509_v6  ;;  %v775_v59 = vmul.f32 %v2513_v10, %v2633_v49  ;;  %v1189_v9 = vadd.f32 %v1157_v53, %v1092_v33 }
 0x15b   : > { %3443 = vst [vmem:[#allocation31_spill] sm:$0xff] %v2920_v62  ;;  %v1352_v42 = vmul.f32 %v2552_v57, %v534_v39  ;;  %v2928_v35 = vmin.f32 %v513_v8, 6.0  ;;  %v773_v29 = vmul.f32 %v2513_v10, %v534_v39  ;;  %v1543_v50 = vmin.f32 %v1511_v41, 6.0  ;;  %v472_v20 = vpop.f32.mrf.mxu2 }
 0x15c   : > { %v804_v3 = vadd.f32 %v772_v52, %v675_v16  ;;  %v900_v60 = vadd.f32 %v868_v7, %v803_v63  ;;  %v1062_v40 = vmul.f32 %v2533_v36, %v534_v39  ;;  %v1383_v46 = vadd.f32 %v1351_v44, %v1286_v30 }
 0x15d   : > { %3444 = vst [vmem:[#allocation32_spill] sm:$0xff] %v2928_v35  ;;  %v1093_v48 = vadd.f32 %v1061_v19, %v996_v54  ;;  %v1097_v49 = vadd.f32 %v1065_v34, %v1000_v4  ;;  %v872_v53 = vmul.f32 %v2849_v26, %v2519_v14  ;;  %v807_v39 = vadd.f32 %v775_v59, %v678_v38 }
 0x15e   : > { %v1415_v22 = vld [vmem:[#allocation2 + $0xc2] sm:$0xff]  ;;  %v1416_v17 = vld [vmem:[#allocation2 + $0xca] sm:$0xff]  ;;  %617 = vst [vmem:[#allocation2 + $0x151] sm:$0xff] %v2928_v35  ;;  %v473_v4 = vadd.f32 %v2909_v2, %v472_v20 }
 0x15f   : > { %v1222_v51 = vld [vmem:[#allocation2 + $0xc8] sm:$0xff]  ;;  %1633 = vmatmul.f32.gmra.mxu1 %v1543_v50  ;;  %v1448_v8 = vmul.f32 %v2557_v0, %v1415_v22  ;;  %v869_v52 = vmul.f32 %v1415_v22, %v2519_v14  ;;  %v1449_v30 = vmul.f32 %v2557_v0, %v1416_v17  ;;  %v1158_v44 = vmul.f32 %v1415_v22, %v2535_v37 }
 0x160   : > { %v1255_v33 = vmul.f32 %v2537_v43, %v1222_v51  ;;  %v676_v41 = vmul.f32 %v1222_v51, %v2509_v6  ;;  %v965_v63 = vmul.f32 %v1222_v51, %v2524_v24  ;;  %v870_v50 = vmul.f32 %v1416_v17, %v2519_v14 }
 0x161   : > { %v1480_v34 = vadd.f32 %v1448_v8, %v1383_v46  ;;  %v901_v19 = vadd.f32 %v869_v52, %v804_v3  ;;  %v1190_v54 = vadd.f32 %v1158_v44, %v1093_v48  ;;  %v514_v35 = vmax.f32 %v473_v4, 0.0  ;;  %v2948_v46 = vld [vmem:[#allocation2 + $0x10a] sm:$0xff] }
 0x162   : > { %v1287_v16 = vadd.f32 %v1255_v33, %v1189_v9  ;;  %v805_v7 = vadd.f32 %v773_v29, %v676_v41  ;;  %v997_v26 = vadd.f32 %v965_v63, %v900_v60  ;;  %v969_v9 = vmul.f32 %v2851_v28, %v2524_v24  ;;  %v3445_v44 = vld [vmem:[#allocation18_spill] sm:$0xff] }
 0x163   : > { %v1512_v62 = vmax.f32 %v1480_v34, 0.0  ;;  %v998_v59 = vadd.f32 %v2759_v13, %v901_v19  ;;  %v1288_v22 = vadd.f32 %v2768_v12, %v1190_v54  ;;  %v2946_v5 = vmin.f32 %v514_v35, 6.0  ;;  %v3446_v4 = vld [vmem:[#allocation26_spill] sm:$0xff]  ;;  %v3447_v34 = vld [vmem:[#allocation19_spill] sm:$0xff]  ;;  %v3448_v19 = vld [vmem:[#allocation24_spill] sm:$0xff] }
 0x164   : > { %v1384_v38 = vadd.f32 %v1352_v42, %v1287_v16  ;;  %v902_v45 = vadd.f32 %v870_v50, %v805_v7  ;;  %v1094_v48 = vadd.f32 %v1062_v40, %v997_v26  ;;  %v1159_v13 = vmul.f32 %v1416_v17, %v2535_v37  ;;  %v3449_v7 = vld [vmem:[#allocation23_spill] sm:$0xff] }
 0x165   : > { %v1544_v3 = vmin.f32 %v1512_v62, 6.0  ;;  %v1095_v51 = vadd.f32 %v2750_v1, %v998_v59  ;;  %618 = vst [vmem:[#allocation2 + $0x159] sm:$0xff] %v2946_v5  ;;  %v1194_v12 = vadd.f32 %v2883_v21, %v1097_v49  ;;  %v904_v35 = vadd.f32 %v872_v53, %v807_v39  ;;  %v2962_v1 = vld [vmem:[#allocation2 + $0x110] sm:$0xff]  ;;  %v475_v49 = vpop.f32.mrf.mxu2 }
 0x166   : > { %v1481_v29 = vadd.f32 %v1449_v30, %v1384_v38  ;;  %v999_v42 = vadd.f32 %v2784_v32, %v902_v45  ;;  %v1454_v8 = vmul.f32 %v2557_v0, %v2948_v46  ;;  %v1066_v62 = vmul.f32 %v2533_v36, %v2680_v61  ;;  %v3451_v59 = vld [vmem:[#allocation30_spill] sm:$0xff] }
 0x167   : > { %1636 = vmatmul.f32.gmra.mxu1 %v1544_v3  ;;  %v1192_v60 = vadd.f32 %v2765_v11, %v1095_v51  ;;  %v679_v32 = vmul.f32 %v2835_v56, %v2509_v6  ;;  %v1385_v26 = vadd.f32 %v2772_v23, %v1288_v22  ;;  %v1191_v21 = vadd.f32 %v1159_v13, %v1094_v48  ;;  %v3452_v3 = vld [vmem:[#allocation28_spill] sm:$0xff] }
 0x168   : > { %v1096_v45 = vadd.f32 %v2788_v15, %v999_v42  ;;  %v1001_v40 = vadd.f32 %v969_v9, %v904_v35  ;;  %v1513_v17 = vmax.f32 %v1481_v29, 0.0  ;;  %v1163_v53 = vmul.f32 %v2916_v25, %v2535_v37  ;;  %v2993_v42 = vld [vmem:[#allocation2 + $0x112] sm:$0xff] }
 0x169   : > { %v1290_v11 = vadd.f32 %v2843_v47, %v1192_v60  ;;  %v776_v33 = vmul.f32 %v2513_v10, %v2650_v18  ;;  %v1292_v56 = vadd.f32 %v2891_v27, %v1194_v12  ;;  %v476_v23 = vadd.f32 %v2909_v2, %v475_v49  ;;  %v3453_v12 = vld [vmem:[#allocation16_spill] sm:$0xff] }
 0x16a   : > { %v1193_v52 = vadd.f32 %v2856_v31, %v1096_v45  ;;  %v1261_v15 = vmul.f32 %v2537_v43, %v2962_v1  ;;  %v1098_v39 = vadd.f32 %v1066_v62, %v1001_v40  ;;  %v1358_v47 = vmul.f32 %v2552_v57, %v2727_v55  ;;  %v3454_v62 = vld [vmem:[#allocation20_spill] sm:$0xff]  ;;  %v3456_v40 = vld [vmem:[#allocation31_spill] sm:$0xff] }
 0x16b   : > { %v1387_v20 = vadd.f32 %v2828_v58, %v1290_v11  ;;  %v808_v30 = vadd.f32 %v776_v33, %v679_v32  ;;  %v1482_v41 = vadd.f32 %v3445_v44, %v1385_v26  ;;  %v1289_v31 = vadd.f32 %v3447_v34, %v1191_v21  ;;  %v3450_v58 = vld [vmem:[#allocation27_spill] sm:$0xff]  ;;  %v3455_v26 = vld [vmem:[#allocation25_spill] sm:$0xff] }
 0x16c   : > { %v1291_v18 = vadd.f32 %v3446_v4, %v1193_v52  ;;  %v515_v16 = vmax.f32 %v476_v23, 0.0  ;;  %v1545_v27 = vmin.f32 %v1513_v17, 6.0  ;;  %v1195_v54 = vadd.f32 %v1163_v53, %v1098_v39  ;;  %v1229_v33 = vld [vmem:[#allocation2 + $0x120] sm:$0xff] }
 0x16d   : > { %v1484_v63 = vadd.f32 %v3448_v19, %v1387_v20  ;;  %v873_v50 = vmul.f32 %v3449_v7, %v2519_v14  ;;  %v1389_v22 = vadd.f32 %v3451_v59, %v1292_v56  ;;  %v970_v29 = vmul.f32 %v3452_v3, %v2524_v24  ;;  %v478_v11 = vpop.f32.mrf.mxu2 }
 0x16e   : > { %v1388_v38 = vadd.f32 %v3450_v58, %v1291_v18  ;;  %v2989_v9 = vmin.f32 %v515_v16, 6.0  ;;  %v1293_v48 = vadd.f32 %v1261_v15, %v1195_v54  ;;  %v1067_v35 = vmul.f32 %v2533_v36, %v3453_v12 }
 0x16f   : > { %1639 = vmatmul.f32.gmra.mxu1 %v1545_v27  ;;  %v1516_v51 = vmax.f32 %v1484_v63, 0.0  ;;  %v905_v13 = vadd.f32 %v873_v50, %v808_v30  ;;  %v1514_v60 = vmax.f32 %v1482_v41, 0.0  ;;  %v1386_v32 = vadd.f32 %v3454_v62, %v1289_v31  ;;  %v3028_v62 = vld [vmem:[#allocation2 + $0x12a] sm:$0xff] }
 0x170   : > { %v1451_v45 = vmul.f32 %v2557_v0, %v3455_v26  ;;  %619 = vst [vmem:[#allocation2 + $0x169] sm:$0xff] %v2989_v9  ;;  %v1485_v17 = vadd.f32 %v3456_v40, %v1388_v38  ;;  %v1164_v53 = vmul.f32 %v2948_v46, %v2535_v37  ;;  %v1486_v52 = vadd.f32 %v1454_v8, %v1389_v22 }
 0x171   : > { %v1548_v21 = vmin.f32 %v1516_v51, 6.0  ;;  %v1002_v49 = vadd.f32 %v970_v29, %v905_v13  ;;  %v1455_v56 = vmul.f32 %v2557_v0, %v2993_v42  ;;  %v479_v23 = vadd.f32 %v2909_v2, %v478_v11  ;;  %v1423_v51 = vld [vmem:[#allocation2 + $0x122] sm:$0xff] }
 0x172   : > { %v680_v15 = vmul.f32 %v2851_v28, %v2509_v6  ;;  %v1390_v20 = vadd.f32 %v1358_v47, %v1293_v48  ;;  %v777_v30 = vmul.f32 %v2513_v10, %v2680_v61  ;;  %v874_v44 = vmul.f32 %v2916_v25, %v2519_v14  ;;  %v3457_v25 = vld [vmem:[#allocation17_spill] sm:$0xff] }
 0x173   : > { %1648 = vmatmul.f32.vlgmr.msra.gmra.mxu3 %v1548_v21  ;;  %v1099_v39 = vadd.f32 %v1067_v35, %v1002_v49  ;;  %v1546_v41 = vmin.f32 %v1514_v60, 6.0  ;;  %v1483_v4 = vadd.f32 %v1451_v45, %v1386_v32  ;;  %v516_v8 = vmax.f32 %v479_v23, 0.0  ;;  %v1230_v60 = vld [vmem:[#allocation2 + $0x128] sm:$0xff] }
 0x174   : > { %v1262_v18 = vmul.f32 %v2537_v43, %v1229_v33  ;;  %v1517_v34 = vmax.f32 %v1485_v17, 0.0  ;;  %v809_v16 = vadd.f32 %v777_v30, %v680_v15  ;;  %v971_v28 = vmul.f32 %v2962_v1, %v2524_v24  ;;  %v3045_v15 = vld [vmem:[#allocation2 + $0x138] sm:$0xff] }
 0x175   : > { %v1196_v31 = vadd.f32 %v1164_v53, %v1099_v39  ;;  %v3016_v27 = vmin.f32 %v516_v8, 6.0  ;;  %v1518_v47 = vmax.f32 %v1486_v52, 0.0  ;;  %v1487_v19 = vadd.f32 %v1455_v56, %v1390_v20  ;;  %v481_v59 = vpop.f32.mrf.mxu2  ;;  %v3458_v53 = vld [vmem:[#allocation21_spill] sm:$0xff] }
 0x176   : > { %v906_v61 = vadd.f32 %v874_v44, %v809_v16  ;;  %v1515_v63 = vmax.f32 %v1483_v4, 0.0  ;;  %v1359_v54 = vmul.f32 %v2552_v57, %v3457_v25  ;;  %v681_v7 = vmul.f32 %v3452_v3, %v2509_v6 }
 0x177   : > { %1642 = vmatmul.f32.gmra.mxu1 %v1546_v41  ;;  %620 = vst [vmem:[#allocation2 + $0x171] sm:$0xff] %v3016_v27  ;;  %v778_v50 = vmul.f32 %v2513_v10, %v3453_v12  ;;  %v1549_v58 = vmin.f32 %v1517_v34, 6.0  ;;  %v1294_v38 = vadd.f32 %v1262_v18, %v1196_v31  ;;  %v1068_v29 = vmul.f32 %v2533_v36, %v2727_v55  ;;  %v3054_v41 = vld [vmem:[#allocation2 + $0x13a] sm:$0xff] }
 0x178   : > { %v1003_v22 = vadd.f32 %v971_v28, %v906_v61  ;;  %v482_v48 = vadd.f32 %v2909_v2, %v481_v59  ;;  %v1550_v13 = vmin.f32 %v1518_v47, 6.0  ;;  %v1519_v35 = vmax.f32 %v1487_v19, 0.0  ;;  %v3459_v61 = vld [vmem:[#allocation22_spill] sm:$0xff] }
 0x179   : > { %v1547_v3 = vmin.f32 %v1515_v63, 6.0  ;;  %v810_v26 = vadd.f32 %v778_v50, %v681_v7  ;;  %v875_v12 = vmul.f32 %v2948_v46, %v2519_v14  ;;  %v1391_v45 = vadd.f32 %v1359_v54, %v1294_v38 }
 0x17a   : > { %v517_v32 = vmax.f32 %v482_v48, 0.0  ;;  %v1456_v21 = vmul.f32 %v2557_v0, %v1423_v51  ;;  %v1100_v40 = vadd.f32 %v1068_v29, %v1003_v22  ;;  %v1165_v17 = vmul.f32 %v2993_v42, %v2535_v37 }
 0x17b   : > { %1651 = vmatmul.f32.gmra.mxu3 %v1549_v58  ;;  %v1263_v49 = vmul.f32 %v2537_v43, %v1230_v60  ;;  %v1360_v52 = vmul.f32 %v2552_v57, %v3458_v53  ;;  %v3042_v56 = vmul.f32 %v2557_v0, %v3028_v62  ;;  %v1551_v46 = vmin.f32 %v1519_v35, 6.0 }
 0x17c   : > { %v3035_v11 = vmin.f32 %v517_v32, 6.0  ;;  %v972_v23 = vmul.f32 %v1229_v33, %v2524_v24  ;;  %v682_v20 = vmul.f32 %v2962_v1, %v2509_v6  ;;  %v779_v39 = vmul.f32 %v2513_v10, %v2727_v55  ;;  %v3062_v1 = vld [vmem:[%s3400_s5] ss:$0 sm:$0xff] }
 0x17d   : > { %v907_v30 = vadd.f32 %v875_v12, %v810_v26  ;;  %v1069_v44 = vmul.f32 %v2533_v36, %v3457_v25  ;;  %v683_v4 = vmul.f32 %v1229_v33, %v2509_v6  ;;  %v780_v8 = vmul.f32 %v2513_v10, %v3457_v25  ;;  %v484_v34 = vpop.f32.mrf.mxu2  ;;  %v2020_v12 = vld [vmem:[%s2418_s20] sm:$0xff] }
 0x17e   : > { %621 = vst [vmem:[#allocation2 + $0x181] sm:$0xff] %v3035_v11  ;;  %v1488_v18 = vadd.f32 %v1456_v21, %v1391_v45  ;;  %v1197_v55 = vadd.f32 %v1165_v17, %v1100_v40  ;;  %v1166_v31 = vmul.f32 %v1423_v51, %v2535_v37  ;;  %v877_v16 = vmul.f32 %v1423_v51, %v2519_v14 }
 0x17f   : > { %1645 = vmatmul.f32.gmra.mxu1 %v1547_v3  ;;  %v485_v28 = vadd.f32 %v2909_v2, %v484_v34  ;;  %v3069_v33 = vmul.f32 %v2537_v43, %v3045_v15  ;;  %v812_v47 = vadd.f32 %v780_v8, %v683_v4  ;;  %v974_v19 = vmul.f32 %v3045_v15, %v2524_v24 }
 0x180   : > { %v3075_v63 = vmul.f32 %v2552_v57, %v3459_v61  ;;  %v3079_v25 = vmul.f32 %v2557_v0, %v3054_v41  ;;  %v811_v54 = vadd.f32 %v779_v39, %v682_v20  ;;  %v876_v2 = vmul.f32 %v2993_v42, %v2519_v14  ;;  %v1232_v42 = vld [vmem:[#allocation2 + $0x140] sm:$0xff] }
 0x181   : > { %v518_v50 = vmax.f32 %v485_v28, 0.0  ;;  %v1004_v58 = vadd.f32 %v972_v23, %v907_v30  ;;  %v909_v38 = vadd.f32 %v877_v16, %v812_v47  ;;  %v1071_v59 = vmul.f32 %v2533_v36, %v3459_v61  ;;  %v3461_v47 = vld [vmem:[#allocation29_spill] sm:$0xff] }
 0x182   : > { %v1520_v29 = vmax.f32 %v1488_v18, 0.0  ;;  %v1295_v51 = vadd.f32 %v1263_v49, %v1197_v55  ;;  %v973_v48 = vmul.f32 %v1230_v60, %v2524_v24  ;;  %v1168_v32 = vmul.f32 %v3054_v41, %v2535_v37  ;;  %v3460_v55 = vld [vmem:[#allocation32_spill] sm:$0xff] }
 0x183   : > { %1654 = vmatmul.f32.gmra.mxu3 %v1550_v13  ;;  %v3087_v13 = vld [vmem:[#allocation2 + $0x150] sm:$0xff]  ;;  %v3089_v35 = vmin.f32 %v518_v50, 6.0  ;;  %v1006_v3 = vadd.f32 %v974_v19, %v909_v38  ;;  %v684_v26 = vmul.f32 %v1230_v60, %v2509_v6  ;;  %v908_v21 = vadd.f32 %v876_v2, %v811_v54 }
 0x184   : > { %v1601_v7 = vpop.f32.mrf.mxu1  ;;  %v1070_v40 = vmul.f32 %v2533_v36, %v3458_v53  ;;  %v781_v17 = vmul.f32 %v2513_v10, %v3458_v53  ;;  %v1101_v49 = vadd.f32 %v1069_v44, %v1004_v58  ;;  %v1266_v20 = vmul.f32 %v2537_v43, %v3087_v13  ;;  %v3121_v58 = vld [vmem:[#allocation2 + $0x158] sm:$0xff] }
 0x185   : > { %v1602_v22 = vadd.f32 %v3062_v1, %v1601_v7  ;;  %622 = vst [vmem:[#allocation2 + $0x189] sm:$0xff] %v3089_v35  ;;  %v1103_v23 = vadd.f32 %v1071_v59, %v1006_v3  ;;  %v878_v39 = vmul.f32 %v3028_v62, %v2519_v14  ;;  %v1167_v60 = vmul.f32 %v3028_v62, %v2535_v37  ;;  %v1426_v7 = vld [vmem:[#allocation2 + $0x142] sm:$0xff] }
 0x186   : > { %v3112_v53 = vmul.f32 %v2537_v43, %v1232_v42  ;;  %v813_v30 = vadd.f32 %v781_v17, %v684_v26  ;;  %v975_v44 = vmul.f32 %v1232_v42, %v2524_v24  ;;  %v1552_v4 = vmin.f32 %v1520_v29, 6.0  ;;  %v3147_v17 = vld [vmem:[#allocation2 + $0x152] sm:$0xff] }
 0x187   : > { %v1697_v45 = vadd.f32 %v2020_v12, %v1602_v22  ;;  %v1392_v8 = vadd.f32 %v1360_v52, %v1295_v51  ;;  %v1200_v18 = vadd.f32 %v1168_v32, %v1103_v23  ;;  %v1363_v34 = vmul.f32 %v2552_v57, %v3460_v55  ;;  %v3149_v23 = vld [vmem:[#allocation2 + $0x168] sm:$0xff] }
 0x188   : > { %v1005_v16 = vadd.f32 %v973_v48, %v908_v21  ;;  %v910_v28 = vadd.f32 %v878_v39, %v813_v30  ;;  %v1072_v19 = vmul.f32 %v2533_v36, %v3461_v47  ;;  %v685_v62 = vmul.f32 %v3045_v15, %v2509_v6  ;;  %v2021_v48 = vld [vmem:[%s2418_s20 + $0x8] sm:$0xff] }
 0x189   : > { %1729 = vst [vmem:[%s3106_s19] sm:$0xff] %v1697_v45  ;;  %v1198_v2 = vadd.f32 %v1166_v31, %v1101_v49  ;;  %v1298_v50 = vadd.f32 %v1266_v20, %v1200_v18  ;;  %v782_v52 = vmul.f32 %v2513_v10, %v3459_v61  ;;  %v3130_v59 = vmul.f32 %v2552_v57, %v3461_v47 }
 0x18a   : > { %v1007_v15 = vadd.f32 %v975_v44, %v910_v28  ;;  %v1169_v31 = vmul.f32 %v1426_v7, %v2535_v37  ;;  %v1489_v22 = vadd.f32 %v3042_v56, %v1392_v8  ;;  %v976_v61 = vmul.f32 %v3087_v13, %v2524_v24 }
 0x18b   : > { %1657 = vmatmul.f32.gmra.mxu3 %v1551_v46  ;;  %v879_v46 = vmul.f32 %v3054_v41, %v2519_v14  ;;  %v3134_v29 = vadd.f32 %v1363_v34, %v1298_v50  ;;  %v814_v51 = vadd.f32 %v782_v52, %v685_v62  ;;  %v1102_v3 = vadd.f32 %v1070_v40, %v1005_v16  ;;  %v3172_v50 = vld [vmem:[#allocation2 + $0x15a] sm:$0xff] }
 0x18c   : > { %v1604_v54 = vpop.f32.mrf.mxu1  ;;  %v1104_v32 = vadd.f32 %v1072_v19, %v1007_v15  ;;  %v1267_v26 = vmul.f32 %v2537_v43, %v3121_v58  ;;  %v1296_v12 = vadd.f32 %v3069_v33, %v1198_v2  ;;  %v1364_v45 = vmul.f32 %v2552_v57, %v2946_v5 }
 0x18d   : > { %v1605_v38 = vadd.f32 %v3062_v1, %v1604_v54  ;;  %v911_v21 = vadd.f32 %v879_v46, %v814_v51  ;;  %v1073_v56 = vmul.f32 %v2533_v36, %v3460_v55  ;;  %v686_v40 = vmul.f32 %v1232_v42, %v2509_v6  ;;  %v3176_v46 = vld [vmem:[#allocation2 + $0x170] sm:$0xff] }
 0x18e   : > { %v1201_v49 = vadd.f32 %v1169_v31, %v1104_v32  ;;  %v783_v20 = vmul.f32 %v2513_v10, %v3461_v47  ;;  %v880_v33 = vmul.f32 %v1426_v7, %v2519_v14  ;;  %v1521_v39 = vmax.f32 %v1489_v22, 0.0  ;;  %v2022_v31 = vld [vmem:[%s2418_s20 + $0x10] sm:$0xff] }
 0x18f   : > { %v1698_v41 = vadd.f32 %v2021_v48, %v1605_v38  ;;  %v3156_v30 = vmul.f32 %v2557_v0, %v1426_v7  ;;  %v1008_v44 = vadd.f32 %v976_v61, %v911_v21  ;;  %v1170_v8 = vmul.f32 %v3147_v17, %v2535_v37 }
 0x190   : > { %v1199_v18 = vadd.f32 %v1167_v60, %v1102_v3  ;;  %v1299_v34 = vadd.f32 %v1267_v26, %v1201_v49  ;;  %v815_v16 = vadd.f32 %v783_v20, %v686_v40  ;;  %v977_v42 = vmul.f32 %v3121_v58, %v2524_v24  ;;  %v3201_v20 = vld [vmem:[#allocation2 + $0x16a] sm:$0xff] }
 0x191   : > { %1730 = vst [vmem:[%s3106_s19 + $0x8] sm:$0xff] %v1698_v41  ;;  %v1393_v47 = vadd.f32 %v3075_v63, %v1296_v12  ;;  %v1105_v19 = vadd.f32 %v1073_v56, %v1008_v44  ;;  %v1268_v62 = vmul.f32 %v2537_v43, %v3149_v23  ;;  %v1074_v54 = vmul.f32 %v2533_v36, %v2946_v5  ;;  %v1237_v56 = vld [vmem:[#allocation2 + $0x180] sm:$0xff] }
 0x192   : > { %v912_v60 = vadd.f32 %v880_v33, %v815_v16  ;;  %v687_v7 = vmul.f32 %v3087_v13, %v2509_v6  ;;  %v1365_v63 = vmul.f32 %v2552_v57, %v2989_v9  ;;  %v784_v38 = vmul.f32 %v2513_v10, %v3460_v55 }
 0x193   : > { %1660 = vmatmul.f32.gmra.mxu3 %v1552_v4  ;;  %v3168_v4 = vadd.f32 %v1364_v45, %v1299_v34  ;;  %v1202_v52 = vadd.f32 %v1170_v8, %v1105_v19  ;;  %v881_v15 = vmul.f32 %v3147_v17, %v2519_v14  ;;  %v1297_v51 = vadd.f32 %v3112_v53, %v1199_v18 }
 0x194   : > { %v1607_v28 = vpop.f32.mrf.mxu1  ;;  %v1009_v13 = vadd.f32 %v977_v42, %v912_v60  ;;  %v1171_v61 = vmul.f32 %v3172_v50, %v2535_v37  ;;  %v1553_v48 = vmin.f32 %v1521_v39, 6.0  ;;  %v816_v3 = vadd.f32 %v784_v38, %v687_v7  ;;  %v1238_v38 = vld [vmem:[#allocation2 + $0x188] sm:$0xff] }
 0x195   : > { %v1608_v2 = vadd.f32 %v3062_v1, %v1607_v28  ;;  %v1300_v41 = vadd.f32 %v1268_v62, %v1202_v52  ;;  %v978_v32 = vmul.f32 %v3149_v23, %v2524_v24  ;;  %v1490_v55 = vadd.f32 %v3079_v25, %v1393_v47  ;;  %v3220_v52 = vld [vmem:[#allocation2 + $0x172] sm:$0xff] }
 0x196   : > { %v1106_v26 = vadd.f32 %v1074_v54, %v1009_v13  ;;  %v1269_v12 = vmul.f32 %v2537_v43, %v3176_v46  ;;  %v1075_v53 = vmul.f32 %v2533_v36, %v2989_v9  ;;  %v913_v21 = vadd.f32 %v881_v15, %v816_v3 }
 0x197   : > { %v1699_v22 = vadd.f32 %v2022_v31, %v1608_v2  ;;  %v3194_v45 = vadd.f32 %v1365_v63, %v1300_v41  ;;  %v688_v49 = vmul.f32 %v3121_v58, %v2509_v6  ;;  %v785_v40 = vmul.f32 %v2513_v10, %v2946_v5  ;;  %v2023_v2 = vld [vmem:[%s2418_s20 + $0x18] sm:$0xff] }
 0x198   : > { %v1394_v25 = vadd.f32 %v3130_v59, %v1297_v51  ;;  %v1203_v33 = vadd.f32 %v1171_v61, %v1106_v26  ;;  %v1366_v39 = vmul.f32 %v2552_v57, %v3016_v27  ;;  %v882_v44 = vmul.f32 %v3172_v50, %v2519_v14 }
 0x199   : > { %1731 = vst [vmem:[%s3106_s19 + $0x10] sm:$0xff] %v1699_v22  ;;  %v1010_v18 = vadd.f32 %v978_v32, %v913_v21  ;;  %v1172_v58 = vmul.f32 %v3201_v20, %v2535_v37  ;;  %v817_v34 = vadd.f32 %v785_v40, %v688_v49  ;;  %v979_v5 = vmul.f32 %v3176_v46, %v2524_v24 }
 0x19a   : > { %v1522_v16 = vmax.f32 %v1490_v55, 0.0  ;;  %v1301_v42 = vadd.f32 %v1269_v12, %v1203_v33  ;;  %v1270_v28 = vmul.f32 %v2537_v43, %v1237_v56  ;;  %v1076_v62 = vmul.f32 %v2533_v36, %v3016_v27 }
 0x19b   : > { %1663 = vmatmul.f32.gmra.mxu3 %v1553_v48  ;;  %v1107_v47 = vadd.f32 %v1075_v53, %v1010_v18  ;;  %v914_v19 = vadd.f32 %v882_v44, %v817_v34  ;;  %v689_v54 = vmul.f32 %v3149_v23, %v2509_v6  ;;  %v1367_v63 = vmul.f32 %v2552_v57, %v3035_v11  ;;  %v2024_v44 = vld [vmem:[%s2418_s20 + $0x20] sm:$0xff] }
 0x19c   : > { %v1610_v8 = vpop.f32.mrf.mxu1  ;;  %v3218_v7 = vadd.f32 %v1366_v39, %v1301_v42  ;;  %v786_v15 = vmul.f32 %v2513_v10, %v2989_v9  ;;  %v1173_v51 = vmul.f32 %v3220_v52, %v2535_v37  ;;  %v883_v23 = vmul.f32 %v3201_v20, %v2519_v14 }
 0x19d   : > { %v1611_v59 = vadd.f32 %v3062_v1, %v1610_v8  ;;  %v1204_v31 = vadd.f32 %v1172_v58, %v1107_v47  ;;  %v1011_v22 = vadd.f32 %v979_v5, %v914_v19  ;;  %v1554_v13 = vmin.f32 %v1522_v16, 6.0  ;;  %v2025_v47 = vld [vmem:[%s2418_s20 + $0x28] sm:$0xff] }
 0x19e   : > { %v1491_v61 = vadd.f32 %v3156_v30, %v1394_v25  ;;  %v818_v48 = vadd.f32 %v786_v15, %v689_v54  ;;  %v980_v41 = vmul.f32 %v1237_v56, %v2524_v24  ;;  %v1271_v55 = vmul.f32 %v2537_v43, %v1238_v38 }
 0x19f   : > { %v1700_v60 = vadd.f32 %v2023_v2, %v1611_v59  ;;  %v1302_v3 = vadd.f32 %v1270_v28, %v1204_v31  ;;  %v1108_v32 = vadd.f32 %v1076_v62, %v1011_v22  ;;  %v1077_v26 = vmul.f32 %v2533_v36, %v3035_v11 }
 0x1a0   : > { %v915_v9 = vadd.f32 %v883_v23, %v818_v48  ;;  %v690_v12 = vmul.f32 %v3176_v46, %v2509_v6  ;;  %v1368_v56 = vmul.f32 %v2552_v57, %v3089_v35  ;;  %v787_v49 = vmul.f32 %v2513_v10, %v3016_v27 }
 0x1a1   : > { %1732 = vst [vmem:[%s3106_s19 + $0x18] sm:$0xff] %v1700_v60  ;;  %v3238_v21 = vadd.f32 %v1367_v63, %v1302_v3  ;;  %v1205_v30 = vadd.f32 %v1173_v51, %v1108_v32  ;;  %v1523_v25 = vmax.f32 %v1491_v61, 0.0  ;;  %v1460_v11 = vmul.f32 %v2557_v0, %v3147_v17  ;;  %v2026_v60 = vld [vmem:[%s2418_s20 + $0x30] sm:$0xff]  ;;  %v2027_v51 = vld [vmem:[%s2418_s20 + $0x38] sm:$0xff]  ;;  %v2028_v32 = vld [vmem:[%s2418_s20 + $0x40] sm:$0xff] }
 0x1a2   : > { %v1012_v33 = vadd.f32 %v980_v41, %v915_v9  ;;  %v819_v6 = vadd.f32 %v787_v49, %v690_v12  ;;  %v884_v46 = vmul.f32 %v3220_v52, %v2519_v14  ;;  %v981_v58 = vmul.f32 %v1238_v38, %v2524_v24  ;;  %v1431_v61 = vld [vmem:[#allocation2 + $0x182] sm:$0xff] }
 0x1a3   : > { %1666 = vmatmul.f32.gmra.mxu3 %v1554_v13  ;;  %v1303_v39 = vadd.f32 %v1271_v55, %v1205_v30  ;;  %v1555_v34 = vmin.f32 %v1523_v25, 6.0  ;;  %v1492_v17 = vadd.f32 %v1460_v11, %v3134_v29  ;;  %v1078_v5 = vmul.f32 %v2533_v36, %v3089_v35  ;;  %v1336_v11 = vld [vmem:[#allocation2 + $0x199] sm:$0xff] }
 0x1a4   : > { %v1613_v53 = vpop.f32.mrf.mxu1  ;;  %v1109_v18 = vadd.f32 %v1077_v26, %v1012_v33  ;;  %v916_v27 = vadd.f32 %v884_v46, %v819_v6  ;;  %v1461_v28 = vmul.f32 %v2557_v0, %v3172_v50  ;;  %v1462_v2 = vmul.f32 %v2557_v0, %v3201_v20  ;;  %v1432_v26 = vld [vmem:[#allocation2 + $0x18a] sm:$0xff]  ;;  %v2030_v33 = vld [vmem:[%s2418_s20 + $0x48] sm:$0xff] }
 0x1a5   : > { %v1614_v40 = vadd.f32 %v3062_v1, %v1613_v53  ;;  %v3251_v10 = vadd.f32 %v1368_v56, %v1303_v39  ;;  %v1524_v42 = vmax.f32 %v1492_v17, 0.0  ;;  %v1463_v22 = vmul.f32 %v2557_v0, %v3220_v52 }
 0x1a6   : > { %v1013_v59 = vadd.f32 %v981_v58, %v916_v27  ;;  %v1493_v62 = vadd.f32 %v1461_v28, %v3168_v4  ;;  %v1494_v38 = vadd.f32 %v1462_v2, %v3194_v45  ;;  %v1464_v3 = vmul.f32 %v2557_v0, %v1431_v61 }
 0x1a7   : > { %v1701_v8 = vadd.f32 %v2024_v44, %v1614_v40  ;;  %v1556_v29 = vmin.f32 %v1524_v42, 6.0  ;;  %v1495_v13 = vadd.f32 %v1463_v22, %v3218_v7  ;;  %v1174_v12 = vmul.f32 %v1431_v61, %v2535_v37  ;;  %v2029_v40 = vld [vmem:[#allocation2] sm:$0xff]  ;;  %v2034_v22 = vld [vmem:[%s2418_s20 + $0x68] sm:$0xff] }
 0x1a8   : > { %v3257_v16 = vadd.f32 %v1078_v5, %v1013_v59  ;;  %v1525_v54 = vmax.f32 %v1493_v62, 0.0  ;;  %v1526_v31 = vmax.f32 %v1494_v38, 0.0  ;;  %v1496_v52 = vadd.f32 %v1464_v3, %v3238_v21  ;;  %v1337_v59 = vld [vmem:[#allocation2 + $0x1a1] sm:$0xff]  ;;  %v2033_v38 = vld [vmem:[%s2418_s20 + $0x60] sm:$0xff] }
 0x1a9   : > { %1733 = vst [vmem:[%s3106_s19 + $0x20] sm:$0xff] %v1701_v8  ;;  %v1527_v41 = vmax.f32 %v1495_v13, 0.0  ;;  %v1465_v53 = vmul.f32 %v2557_v0, %v1432_v26  ;;  %v1206_v49 = vadd.f32 %v1174_v12, %v1109_v18  ;;  %v1272_v25 = vmul.f32 %v2029_v40, %v2537_v43  ;;  %v1433_v8 = vld [vmem:[#allocation2 + $0x19a] sm:$0xff] }
 0x1aa   : > { %v1557_v50 = vmin.f32 %v1525_v54, 6.0  ;;  %v1558_v20 = vmin.f32 %v1526_v31, 6.0  ;;  %v1528_v56 = vmax.f32 %v1496_v52, 0.0  ;;  %v1369_v21 = vmul.f32 %v2552_v57, %v1336_v11  ;;  %v2035_v61 = vld [vmem:[%s2418_s20 + $0x70] sm:$0xff]  ;;  %v2037_v52 = vld [vmem:[%s2418_s20 + $0x78] sm:$0xff] }
 0x1ab   : > { %1669 = vmatmul.f32.gmra.mxu3 %v1555_v34  ;;  %v1559_v9 = vmin.f32 %v1527_v41, 6.0  ;;  %v1497_v46 = vadd.f32 %v1465_v53, %v3251_v10  ;;  %v1304_v44 = vadd.f32 %v1272_v25, %v1206_v49  ;;  %v1175_v58 = vmul.f32 %v1432_v26, %v2535_v37  ;;  %v2036_v41 = vld [vmem:[%s2418_s20 + $0x80] sm:$0xff]  ;;  %v2039_v49 = vld [vmem:[%s2418_s20 + $0x90] sm:$0xff] }
 0x1ac   : > { %v1616_v14 = vpop.f32.mrf.mxu1  ;;  %v1560_v6 = vmin.f32 %v1528_v56, 6.0  ;;  %v1466_v27 = vmul.f32 %v2557_v0, %v1433_v8  ;;  %v1370_v37 = vmul.f32 %v2552_v57, %v1337_v59 }
 0x1ad   : > { %v1617_v24 = vadd.f32 %v3062_v1, %v1616_v14  ;;  %v1529_v34 = vmax.f32 %v1497_v46, 0.0  ;;  %v1401_v17 = vadd.f32 %v1369_v21, %v1304_v44  ;;  %v1207_v5 = vadd.f32 %v1175_v58, %v3257_v16  ;;  %v2031_v14 = vld [vmem:[%s2418_s20 + $0x50] sm:$0xff]  ;;  %v2041_v46 = vld [vmem:[%s2418_s20 + $0xa0] sm:$0xff] }
 0x1af   : > { %v1702_v19 = vadd.f32 %v2025_v47, %v1617_v24  ;;  %v1561_v10 = vmin.f32 %v1529_v34, 6.0  ;;  %v1498_v42 = vadd.f32 %v1466_v27, %v1401_v17  ;;  %v1305_v28 = vadd.f32 %v1272_v25, %v1207_v5  ;;  %v1434_v47 = vld [vmem:[#allocation2 + $0x1a2] sm:$0xff] }
 0x1b0   : > { %v2043_v17 = vld [vmem:[%s2418_s20 + $0xb0] sm:$0xff] }
 0x1b1   : > { %1734 = vst [vmem:[%s3106_s19 + $0x28] sm:$0xff] %v1702_v19  ;;  %v1530_v62 = vmax.f32 %v1498_v42, 0.0  ;;  %v1402_v16 = vadd.f32 %v1370_v37, %v1305_v28  ;;  %v2045_v37 = vld [vmem:[%s2418_s20 + $0xc0] sm:$0xff] }
 0x1b3   : > { %1672 = vmatmul.f32.gmra.mxu3 %v1556_v29  ;;  %v1562_v2 = vmin.f32 %v1530_v62, 6.0  ;;  %v2046_v62 = vld [vmem:[%s2418_s20 + $0xc8] sm:$0xff] }
 0x1b4   : > { %v1619_v36 = vpop.f32.mrf.mxu1 }
 0x1b5   : > { %v1620_v35 = vadd.f32 %v3062_v1, %v1619_v36  ;;  %v1467_v36 = vmul.f32 %v2557_v0, %v1434_v47 }
 0x1b7   : > { %v1703_v63 = vadd.f32 %v2026_v60, %v1620_v35  ;;  %v2032_v35 = vld [vmem:[%s2418_s20 + $0x58] sm:$0xff]  ;;  %v1499_v60 = vadd.f32 %v1467_v36, %v1402_v16 }
 0x1b9   : > { %1735 = vst [vmem:[%s3106_s19 + $0x30] sm:$0xff] %v1703_v63 }
 0x1bb   : > { %1675 = vmatmul.f32.gmra.mxu3 %v1557_v50  ;;  %v1531_v50 = vmax.f32 %v1499_v60, 0.0 }
 0x1bc   : > { %v1622_v15 = vpop.f32.mrf.mxu1 }
 0x1bd   : > { %v1623_v4 = vadd.f32 %v3062_v1, %v1622_v15 }
 0x1bf   : > { %v1704_v23 = vadd.f32 %v2027_v51, %v1623_v4  ;;  %v1563_v4 = vmin.f32 %v1531_v50, 6.0 }
 0x1c1   : > { %1736 = vst [vmem:[%s3106_s19 + $0x38] sm:$0xff] %v1704_v23 }
 0x1c3   : > { %1678 = vmatmul.f32.gmra.mxu3 %v1558_v20 }
 0x1c4   : > { %v1625_v48 = vpop.f32.mrf.mxu1 }
 0x1c5   : > { %v1626_v45 = vadd.f32 %v3062_v1, %v1625_v48 }
 0x1c7   : > { %v1705_v55 = vadd.f32 %v2028_v32, %v1626_v45 }
 0x1c9   : > { %1737 = vst [vmem:[%s3106_s19 + $0x40] sm:$0xff] %v1705_v55 }
 0x1cb   : > { %1681 = vmatmul.f32.gmra.mxu3 %v1559_v9 }
 0x1cc   : > { %v1628_v7 = vpop.f32.mrf.mxu1 }
 0x1cd   : > { %v1629_v30 = vadd.f32 %v3062_v1, %v1628_v7  ;;  %v2038_v7 = vld [vmem:[%s2418_s20 + $0x88] sm:$0xff] }
 0x1cf   : > { %v1706_v39 = vadd.f32 %v2030_v33, %v1629_v30  ;;  %v2040_v33 = vld [vmem:[%s2418_s20 + $0x98] sm:$0xff] }
 0x1d1   : > { %1738 = vst [vmem:[%s3106_s19 + $0x48] sm:$0xff] %v1706_v39 }
 0x1d3   : > { %1684 = vmatmul.f32.gmra.mxu3 %v1560_v6 }
 0x1d4   : > { %v1631_v18 = vpop.f32.mrf.mxu1 }
 0x1d5   : > { %v1632_v43 = vadd.f32 %v3062_v1, %v1631_v18  ;;  %v2042_v18 = vld [vmem:[%s2418_s20 + $0xa8] sm:$0xff] }
 0x1d7   : > { %v1707_v24 = vadd.f32 %v2031_v14, %v1632_v43 }
 0x1d9   : > { %1739 = vst [vmem:[%s3106_s19 + $0x50] sm:$0xff] %v1707_v24  ;;  %v2044_v24 = vld [vmem:[%s2418_s20 + $0xb8] sm:$0xff] }
 0x1db   : > { %1687 = vmatmul.f32.gmra.mxu3 %v1561_v10 }
 0x1dc   : > { %v1634_v19 = vpop.f32.mrf.mxu1 }
 0x1dd   : > { %v1635_v29 = vadd.f32 %v3062_v1, %v1634_v19 }
 0x1df   : > { %v1708_v54 = vadd.f32 %v2032_v35, %v1635_v29 }
 0x1e1   : > { %1740 = vst [vmem:[%s3106_s19 + $0x58] sm:$0xff] %v1708_v54  ;;  %v2047_v54 = vld [vmem:[%s2418_s20 + $0xd0] sm:$0xff] }
 0x1e3   : > { %1690 = vmatmul.f32.gmra.mxu3 %v1562_v2 }
 0x1e4   : > { %v1637_v57 = vpop.f32.mrf.mxu1 }
 0x1e5   : > { %v1638_v63 = vadd.f32 %v3062_v1, %v1637_v57 }
 0x1e7   : > { %v1709_v15 = vadd.f32 %v2033_v38, %v1638_v63  ;;  %v2048_v63 = vld [vmem:[%s2418_s20 + $0xd8] sm:$0xff] }
 0x1e9   : > { %1741 = vst [vmem:[%s3106_s19 + $0x60] sm:$0xff] %v1709_v15 }
 0x1eb   : > { %1693 = vmatmul.f32.gmra.mxu3 %v1563_v4  ;;  %v2049_v4 = vld [vmem:[%s2418_s20 + $0xe0] sm:$0xff] }
 0x1ec   : > { %v1640_v0 = vpop.f32.mrf.mxu1 }
 0x1ed   : > { %v1641_v31 = vadd.f32 %v3062_v1, %v1640_v0 }
 0x1ef   : > { %v1710_v51 = vadd.f32 %v2034_v22, %v1641_v31 }
 0x1f1   : > { %1742 = vst [vmem:[%s3106_s19 + $0x68] sm:$0xff] %v1710_v51  ;;  %v2050_v51 = vld [vmem:[%s2418_s20 + $0xe8] sm:$0xff] }
 0x1f4   : > { %v1643_v23 = vpop.f32.mrf.mxu1 }
 0x1f5   : > { %v1644_v20 = vadd.f32 %v3062_v1, %v1643_v23 }
 0x1f6   : > { %v1649_v13 = vpop.f32.mrf.mxu3 }
 0x1f7   : > { %v1711_v48 = vadd.f32 %v2035_v61, %v1644_v20  ;;  %v1650_v45 = vadd.f32 %v3062_v1, %v1649_v13  ;;  %v2051_v61 = vld [vmem:[%s2418_s20 + $0xf0] sm:$0xff] }
 0x1f9   : > { %1743 = vst [vmem:[%s3106_s19 + $0x70] sm:$0xff] %v1711_v48  ;;  %v1713_v3 = vadd.f32 %v2036_v41, %v1650_v45 }
 0x1fb   : > { %1745 = vst [vmem:[%s3106_s19 + $0x80] sm:$0xff] %v1713_v3  ;;  %v2052_v3 = vld [vmem:[%s2418_s20 + $0xf8] sm:$0xff] }
 0x1fc   : > { %v1646_v32 = vpop.f32.mrf.mxu1 }
 0x1fd   : > { %v1647_v55 = vadd.f32 %v3062_v1, %v1646_v32 }
 0x1fe   : > { %v1652_v9 = vpop.f32.mrf.mxu3 }
 0x1ff   : > { %v1712_v26 = vadd.f32 %v2037_v52, %v1647_v55  ;;  %v1653_v12 = vadd.f32 %v3062_v1, %v1652_v9 }
 0x201   : > { %1744 = vst [vmem:[%s3106_s19 + $0x78] sm:$0xff] %v1712_v26  ;;  %v1714_v53 = vadd.f32 %v2038_v7, %v1653_v12 }
 0x203   : > { %1746 = vst [vmem:[%s3106_s19 + $0x88] sm:$0xff] %v1714_v53 }
 0x206   : > { %v1655_v30 = vpop.f32.mrf.mxu3 }
 0x207   : > { %v1656_v56 = vadd.f32 %v3062_v1, %v1655_v30 }
 0x209   : > { %v1715_v40 = vadd.f32 %v2039_v49, %v1656_v56 }
 0x20b   : > { %1747 = vst [vmem:[%s3106_s19 + $0x90] sm:$0xff] %v1715_v40 }
 0x20e   : > { %v1658_v25 = vpop.f32.mrf.mxu3 }
 0x20f   : > { %v1659_v11 = vadd.f32 %v3062_v1, %v1658_v25 }
 0x211   : > { %v1716_v39 = vadd.f32 %v2040_v33, %v1659_v11 }
 0x213   : > { %1748 = vst [vmem:[%s3106_s19 + $0x98] sm:$0xff] %v1716_v39 }
 0x216   : > { %v1661_v21 = vpop.f32.mrf.mxu3 }
 0x217   : > { %v1662_v6 = vadd.f32 %v3062_v1, %v1661_v21 }
 0x219   : > { %v1717_v44 = vadd.f32 %v2041_v46, %v1662_v6 }
 0x21b   : > { %1749 = vst [vmem:[%s3106_s19 + $0xa0] sm:$0xff] %v1717_v44 }
 0x21e   : > { %v1664_v8 = vpop.f32.mrf.mxu3 }
 0x21f   : > { %v1665_v58 = vadd.f32 %v3062_v1, %v1664_v8 }
 0x221   : > { %v1718_v27 = vadd.f32 %v2042_v18, %v1665_v58 }
 0x223   : > { %1750 = vst [vmem:[%s3106_s19 + $0xa8] sm:$0xff] %v1718_v27 }
 0x226   : > { %v1667_v43 = vpop.f32.mrf.mxu3 }
 0x227   : > { %v1668_v34 = vadd.f32 %v3062_v1, %v1667_v43 }
 0x229   : > { %v1719_v5 = vadd.f32 %v2043_v17, %v1668_v34 }
 0x22b   : > { %1751 = vst [vmem:[%s3106_s19 + $0xb0] sm:$0xff] %v1719_v5 }
 0x22e   : > { %v1670_v59 = vpop.f32.mrf.mxu3 }
 0x22f   : > { %v1671_v14 = vadd.f32 %v3062_v1, %v1670_v59 }
 0x231   : > { %v1720_v10 = vadd.f32 %v2044_v24, %v1671_v14 }
 0x233   : > { %1752 = vst [vmem:[%s3106_s19 + $0xb8] sm:$0xff] %v1720_v10 }
 0x236   : > { %v1673_v42 = vpop.f32.mrf.mxu3 }
 0x237   : > { %v1674_v28 = vadd.f32 %v3062_v1, %v1673_v42 }
 0x239   : > { %v1721_v47 = vadd.f32 %v2045_v37, %v1674_v28 }
 0x23b   : > { %1753 = vst [vmem:[%s3106_s19 + $0xc0] sm:$0xff] %v1721_v47 }
 0x23e   : > { %v1676_v19 = vpop.f32.mrf.mxu3 }
 0x23f   : > { %v1677_v29 = vadd.f32 %v3062_v1, %v1676_v19 }
 0x241   : > { %v1722_v16 = vadd.f32 %v2046_v62, %v1677_v29 }
 0x243   : > { %1754 = vst [vmem:[%s3106_s19 + $0xc8] sm:$0xff] %v1722_v16 }
 0x246   : > { %v1679_v36 = vpop.f32.mrf.mxu3 }
 0x247   : > { %v1680_v35 = vadd.f32 %v3062_v1, %v1679_v36 }
 0x249   : > { %v1723_v2 = vadd.f32 %v2047_v54, %v1680_v35 }
 0x24b   : > { %1755 = vst [vmem:[%s3106_s19 + $0xd0] sm:$0xff] %v1723_v2 }
 0x24e   : > { %v1682_v60 = vpop.f32.mrf.mxu3 }
 0x24f   : > { %v1683_v57 = vadd.f32 %v3062_v1, %v1682_v60 }
 0x251   : > { %v1724_v50 = vadd.f32 %v2048_v63, %v1683_v57 }
 0x253   : > { %1756 = vst [vmem:[%s3106_s19 + $0xd8] sm:$0xff] %v1724_v50 }
 0x256   : > { %v1685_v38 = vpop.f32.mrf.mxu3 }
 0x257   : > { %v1686_v15 = vadd.f32 %v3062_v1, %v1685_v38 }
 0x259   : > { %v1725_v0 = vadd.f32 %v2049_v4, %v1686_v15 }
 0x25b   : > { %1757 = vst [vmem:[%s3106_s19 + $0xe0] sm:$0xff] %v1725_v0 }
 0x25e   : > { %v1688_v31 = vpop.f32.mrf.mxu3 }
 0x25f   : > { %v1689_v22 = vadd.f32 %v3062_v1, %v1688_v31 }
 0x261   : > { %v1726_v23 = vadd.f32 %v2050_v51, %v1689_v22 }
 0x263   : > { %1758 = vst [vmem:[%s3106_s19 + $0xe8] sm:$0xff] %v1726_v23 }
 0x266   : > { %v1691_v20 = vpop.f32.mrf.mxu3 }
 0x267   : > { %v1692_v13 = vadd.f32 %v3062_v1, %v1691_v20 }
 0x269   : > { %v1727_v48 = vadd.f32 %v2051_v61, %v1692_v13 }
 0x26b   : > { %1759 = vst [vmem:[%s3106_s19 + $0xf0] sm:$0xff] %v1727_v48 }
 0x26e   : > { %v1694_v45 = vpop.f32.mrf.mxu3 }
 0x26f   : > { %v1695_v41 = vadd.f32 %v3062_v1, %v1694_v45 }
 0x271   : > { %v1728_v32 = vadd.f32 %v2052_v3, %v1695_v41 }
 0x273   : > { %1760 = vst [vmem:[%s3106_s19 + $0xf8] sm:$0xff] %v1728_v32 }
 0x274   : > { %2200 = shalt.err (!%p2197_p10)
}
 0x275   : > { %s2257_s18 = smov 128   ;;  %s2258_s20 = smov 8  }
 0x276   : > { %1947 = dma.vmem_to_hbm [thread:$0]  (%p2382_p3), %s1775_s15, 4096, %s1777_s16, %s1762_s27, %s2257_s18, %s2257_s18, %s2258_s20  }
 0x277 PF: > { %s1791_s19 = sand.u32 1, %s2235_s21   ;;  %p3462_p12 = scmp.ge.s32.totalorder %s2247_s24, 2 }
 0x278   : > { %s1792_s29 = scalar_lea.sflag [#allocation5], %s1791_s19 }
 0x279   : > { %p1964_p13 = pnand %p3462_p12, %p2329_p6 }
 0x27b   : > { %p1965_p0 = pneg %p1964_p13 }
 0x27d   : > { %2230 = dma.done.wait (%p1965_p0), %s1792_s29, 4096  }
 0x27e   : > { %2232 = vsyncadd (%p1965_p0), %s1792_s29, 4294963200  ;;  %p21_p5 = scmp.ge.s32.totalorder %s2369_s10, 4   ;;  %s3463_s21 = smov %s2239_s22 }
 0x27f   : > { %s3464_s22 = smov %s2243_s23  ;;  %s3465_s23 = smov %s2378_s14 }
 0x280   : > { %s3466_s24 = smov %s2369_s10  ;;  %23 = sbr.rel (!%p21_p5) target bundleno = 7 (0x7), region = 104 }
 0x285   :  { %1798 = vsyncpa [#allocation4], 1 }
 0x286   :  { %1800 = vsyncpa [#allocation4 + $0x1], 1 }
 0x287   :  { %1801 = vsyncpa [#allocation7], 1 }
 0x288   :  { %1802 = vsyncpa [#allocation10], 1 }
 0x289   :  { %1803 = vsyncpa [#allocation5], 1 }
 0x28a   :  { %1805 = vsyncpa [#allocation5 + $0x1], 1 }

</bundles_post_ra>
